<compile_context>
chip_gen: v5e
topology: v5e:2x2
jax: 0.10.0
libtpu: 0.0.40
codegen_flags: <defaults>
</compile_context>

<pallas_src>
import jax
import jax.numpy as jnp
from jax import lax
from jax.experimental import pallas as pl
from jax.experimental.pallas import tpu as pltpu


# ----------------------------------------------------------------------------
# Fast path: VMEM-resident tables + one-hot MXU gather
# ----------------------------------------------------------------------------
def _mf_resident_kernel(u_idx_ref, i_idx_ref,     # (block_b, 1) int32 VMEM tiles
                        users_ref, items_ref,     # full tables, resident in VMEM
                        out_ref):                 # (1, block_b) f32
    block_b = u_idx_ref.shape[0]
    n_users, embed = users_ref.shape
    n_items = items_ref.shape[0]

    u_idx = u_idx_ref[...]                        # (block_b, 1)
    i_idx = i_idx_ref[...]

    # One-hot gather on the MXU: (block_b, n_rows) @ (n_rows, E) -> (block_b, E).
    # Precision HIGHEST keeps the gather bit-exact in f32 (one 1.0 per row).
    u_iota = lax.broadcasted_iota(jnp.int32, (block_b, n_users), 1)
    i_iota = lax.broadcasted_iota(jnp.int32, (block_b, n_items), 1)
    onehot_u = (u_idx == u_iota).astype(jnp.float32)
    onehot_i = (i_idx == i_iota).astype(jnp.float32)

    u_rows = jnp.dot(onehot_u, users_ref[...],
                     precision=lax.Precision.HIGHEST,
                     preferred_element_type=jnp.float32)          # (block_b, E)
    i_rows = jnp.dot(onehot_i, items_ref[...],
                     precision=lax.Precision.HIGHEST,
                     preferred_element_type=jnp.float32)          # (block_b, E)

    # f32 elementwise product (VPU) + reduction over E via ones-matmul so the
    # result is produced lane-dense as (1, block_b).
    prod = u_rows * i_rows
    ones = jnp.ones((1, embed), dtype=jnp.float32)
    out_ref[...] = lax.dot_general(
        ones, prod, dimension_numbers=(((1,), (1,)), ((), ())),
        precision=lax.Precision.HIGHEST,
        preferred_element_type=jnp.float32)                       # (1, block_b)


def _mf_forward_resident(u_pad, i_pad, users, items, block_b, num_tiles, vmem_cap):
    b_pad = u_pad.shape[0]
    n_users, embed = users.shape
    n_items = items.shape[0]

    u2 = u_pad.reshape(b_pad, 1)
    i2 = i_pad.reshape(b_pad, 1)

    grid_spec = pltpu.PrefetchScalarGridSpec(
        num_scalar_prefetch=0,
        grid=(num_tiles,),
        in_specs=[
            pl.BlockSpec((block_b, 1), lambda t: (t, 0)),      # user indices
            pl.BlockSpec((block_b, 1), lambda t: (t, 0)),      # item indices
            pl.BlockSpec((n_users, embed), lambda t: (0, 0)),  # users table (resident)
            pl.BlockSpec((n_items, embed), lambda t: (0, 0)),  # items table (resident)
        ],
        out_specs=pl.BlockSpec((None, 1, block_b), lambda t: (t, 0, 0)),
    )

    tables_bytes = (n_users + n_items) * embed * 4
    onehot_bytes = 2 * block_b * (n_users + n_items) * 4
    vmem_limit = min(int(vmem_cap * 0.9),
                     max(32 << 20,
                         2 * tables_bytes + 2 * onehot_bytes
                         + 8 * block_b * embed * 4 + (4 << 20)))

    return pl.pallas_call(
        _mf_resident_kernel,
        grid_spec=grid_spec,
        out_shape=jax.ShapeDtypeStruct((num_tiles, 1, block_b), jnp.float32),
        compiler_params=pltpu.CompilerParams(
            dimension_semantics=("parallel",),     # batch tiles independent (v7x megacore)
            vmem_limit_bytes=vmem_limit,
        ),
        cost_estimate=pl.CostEstimate(
            flops=2 * b_pad * embed * (n_users + n_items) + 4 * b_pad * embed,
            transcendentals=0,
            bytes_accessed=tables_bytes + 2 * b_pad * 4 + b_pad * 4,
        ),
    )(u2, i2, users, items)


# ----------------------------------------------------------------------------
# Fallback path: HBM-resident tables, manual row-gather DMA (double-buffered)
# ----------------------------------------------------------------------------
def _mf_hbm_kernel(u_idx_ref, i_idx_ref,          # scalar-prefetch SMEM: (b_pad,) int32
                   users_hbm, items_hbm,          # tables, left in HBM
                   out_ref,                       # (1, block_b) f32
                   u_rows, i_rows,                # VMEM (2*block_b, E) double buffers
                   u_sems, i_sems):               # DMA sems, shape (2,) each
    t = pl.program_id(0)
    n_tiles = pl.num_programs(0)
    two_b, embed = u_rows.shape
    block_b = two_b // 2

    def issue_tile(tile, slot):
        base = tile * block_b
        dst0 = slot * block_b

        def body(r, carry):
            u_row = u_idx_ref[base + r]
            i_row = i_idx_ref[base + r]
            pltpu.make_async_copy(users_hbm.at[pl.ds(u_row, 1), :],
                                  u_rows.at[pl.ds(dst0 + r, 1), :],
                                  u_sems.at[slot]).start()
            pltpu.make_async_copy(items_hbm.at[pl.ds(i_row, 1), :],
                                  i_rows.at[pl.ds(dst0 + r, 1), :],
                                  i_sems.at[slot]).start()
            return carry

        # Partially unrolled issue loop: keeps code compact, LLO still sees the
        # stream of descriptors.
        lax.fori_loop(0, block_b, body, 0, unroll=8)

    # Prime the pipeline with tile 0 on the first grid step.
    @pl.when(t == 0)
    def _():
        issue_tile(0, 0)

    # Prefetch tile t+1 into the other slot BEFORE waiting on tile t, so next
    # tile's HBM gather overlaps this tile's wait/compute/store.
    @pl.when(t + 1 < n_tiles)
    def _():
        issue_tile(t + 1, (t + 1) % 2)

    slot = t % 2
    off = pl.multiple_of(slot * block_b, block_b)
    u_buf = u_rows.at[pl.ds(off, block_b), :]
    i_buf = i_rows.at[pl.ds(off, block_b), :]

    # Aggregate waits: DMA semaphores count bytes, and every started copy on
    # this slot is one E-wide row, so a single (block_b, E)-sized wait per
    # semaphore drains all block_b row copies at once (src/dst here are only
    # used to size the wait; they were never .start()ed).
    pltpu.make_async_copy(i_buf, u_buf, u_sems.at[slot]).wait()
    pltpu.make_async_copy(u_buf, i_buf, i_sems.at[slot]).wait()

    prod = u_rows[pl.ds(off, block_b), :] * i_rows[pl.ds(off, block_b), :]
    ones = jnp.ones((1, embed), dtype=jnp.float32)
    out_ref[...] = lax.dot_general(
        ones, prod, dimension_numbers=(((1,), (1,)), ((), ())),
        precision=lax.Precision.HIGHEST,
        preferred_element_type=jnp.float32)


def _mf_forward_hbm(u_pad, i_pad, users, items, block_b, num_tiles, vmem_cap):
    b_pad = u_pad.shape[0]
    n_users, embed = users.shape
    n_items = items.shape[0]

    grid_spec = pltpu.PrefetchScalarGridSpec(
        num_scalar_prefetch=2,                    # u_pad, i_pad -> SMEM
        grid=(num_tiles,),
        in_specs=[
            pl.BlockSpec(memory_space=pl.ANY),    # users table stays in HBM
            pl.BlockSpec(memory_space=pl.ANY),    # items table stays in HBM
        ],
        out_specs=pl.BlockSpec((None, 1, block_b),
                               lambda t, u_ref, i_ref: (t, 0, 0)),
        scratch_shapes=[
            pltpu.VMEM((2 * block_b, embed), jnp.float32),   # user rows (2 slots)
            pltpu.VMEM((2 * block_b, embed), jnp.float32),   # item rows (2 slots)
            pltpu.SemaphoreType.DMA((2,)),                   # user sems per slot
            pltpu.SemaphoreType.DMA((2,)),                   # item sems per slot
        ],
    )

    # TODO(synk): for very large block_b add a rolling semaphore window and
    # sorted/deduped indices with coalesced multi-row DMAs.
    return pl.pallas_call(
        _mf_hbm_kernel,
        grid_spec=grid_spec,
        out_shape=jax.ShapeDtypeStruct((num_tiles, 1, block_b), jnp.float32),
        compiler_params=pltpu.CompilerParams(
            # Cross-tile prefetch carries state across grid steps -> sequential.
            dimension_semantics=("arbitrary",),
            vmem_limit_bytes=min(int(vmem_cap * 0.9),
                                 max(16 << 20,
                                     8 * block_b * embed * 4 + (4 << 20))),
        ),
        cost_estimate=pl.CostEstimate(
            flops=4 * b_pad * embed,
            transcendentals=0,
            bytes_accessed=2 * b_pad * embed * 4 + 2 * b_pad * 4 + b_pad * 4,
        ),
    )(u_pad, i_pad, users, items)


# ----------------------------------------------------------------------------
# Wrapper
# ----------------------------------------------------------------------------
def _vmem_capacity_bytes():
    try:
        return int(pltpu.get_tpu_info().vmem_capacity_bytes)
    except Exception:
        return 64 * 1024 * 1024   # conservative: v7x per-TensorCore VMEM


def _choose_block_b(B, n_users, n_items, resident):
    target = 512
    if resident:
        # Keep the (block_b, n_rows) one-hot intermediates modest.
        while target > 128 and target * (n_users + n_items) * 4 > (8 << 20):
            target //= 2
    # v7x megacore: prefer >= 2 grid tiles when the batch allows.
    cap = 128 * pl.cdiv(pl.cdiv(B, 128), 2)
    return max(128, min(target, cap))


def matrix_factorization_forward(u, i, users, items, *, block_b=None, force_path=None):
    """Pallas TPU implementation of MatrixFactorization.forward.

    u, i  : int index vectors, shape (B,)
    users : (n_users, embed_size) float
    items : (n_items, embed_size) float
    returns (B,) float32  ==  (items[i] * users[u]).sum(-1)
    """
    B = int(u.shape[0])
    users = users.astype(jnp.float32)
    items = items.astype(jnp.float32)
    n_users, embed = users.shape
    n_items, embed_i = items.shape
    assert embed == embed_i

    vmem_cap = _vmem_capacity_bytes()
    table_budget = int(vmem_cap * 0.7)          # ~45 MiB on v7x, ~90 MiB on v5e/v6e
    tables_bytes = (n_users + n_items) * embed * 4
    resident = (tables_bytes <= table_budget) and ((n_users + n_items) <= 32768)
    if force_path == "resident":
        resident = True
    elif force_path == "hbm":
        resident = False

    if block_b is None:
        block_b = _choose_block_b(B, n_users, n_items, resident)
    num_tiles = pl.cdiv(B, block_b)
    b_pad = num_tiles * block_b

    # Pad indices to a whole number of batch tiles (index 0 is always valid;
    # padded rows are dropped after the kernel).
    u_pad = jnp.zeros((b_pad,), jnp.int32).at[:B].set(u.astype(jnp.int32))
    i_pad = jnp.zeros((b_pad,), jnp.int32).at[:B].set(i.astype(jnp.int32))

    if resident:
        out = _mf_forward_resident(u_pad, i_pad, users, items, block_b, num_tiles, vmem_cap)
    else:
        out = _mf_forward_hbm(u_pad, i_pad, users, items, block_b, num_tiles, vmem_cap)

    return out.reshape(b_pad)[:B]


if __name__ == "__main__":
    # Small, deterministic problem consistent with the module's __init__.
    n_items, n_users, embed_size = 16, 12, 32
    batch = 8

    key = jax.random.PRNGKey(0)
    k_items, k_users, k_u, k_i = jax.random.split(key, 4)

    items = jax.random.normal(k_items, (n_items, embed_size), dtype=jnp.float32)
    users = jax.random.normal(k_users, (n_users, embed_size), dtype=jnp.float32)
    u = jax.random.randint(k_u, (batch,), 0, n_users, dtype=jnp.int32)
    i = jax.random.randint(k_i, (batch,), 0, n_items, dtype=jnp.int32)

    # Pure-JAX reference (same semantics as the PyTorch forward).
    ref = jnp.sum(items[i] * users[u], axis=-1)

    # Fast path (VMEM-resident tables + one-hot MXU gather) — default for small tables.
    out_fast = jax.block_until_ready(matrix_factorization_forward(u, i, users, items))
    assert out_fast.shape == (batch,)
    assert jnp.allclose(out_fast, ref, atol=1e-5, rtol=1e-5), (out_fast, ref)

    # Large-table fallback (HBM row-gather DMA, double-buffered), forced for validation.
    out_hbm = jax.block_until_ready(
        matrix_factorization_forward(u, i, users, items, force_path="hbm"))
    assert out_hbm.shape == (batch,)
    assert jnp.allclose(out_hbm, ref, atol=1e-5, rtol=1e-5), (out_hbm, ref)

    print("KERNEL_OK")
</pallas_src>

<mosaic_0001>
module attributes {stable_mosaic.version = 11 : i64} {
  func.func @_mf_resident_kernel(%arg0: i32, %arg1: memref<128x1xi32, #tpu.memory_space<vmem>>, %arg2: memref<128x1xi32, #tpu.memory_space<vmem>>, %arg3: memref<12x32xf32, #tpu.memory_space<vmem>>, %arg4: memref<16x32xf32, #tpu.memory_space<vmem>>, %arg5: memref<1x1x128xf32, #tpu.memory_space<vmem>>) attributes {dimension_semantics = [#tpu.dimension_semantics<parallel>], iteration_bounds = array<i64: 1>, scalar_prefetch = 0 : i64, scratch_operands = 0 : i64, tpu.core_type = #tpu.core_type<tc>, window_params = [{transform_indices = @transform_0, window_bounds = array<i64: 128, 1>}, {transform_indices = @transform_1, window_bounds = array<i64: 128, 1>}, {pipeline_mode = #tpu.pipeline_mode<synchronous>, transform_indices = @transform_2, window_bounds = array<i64: 12, 32>}, {pipeline_mode = #tpu.pipeline_mode<synchronous>, transform_indices = @transform_3, window_bounds = array<i64: 16, 32>}, {transform_indices = @transform_4, window_bounds = array<i64: 1, 1, 128>}]} {
    %c0 = arith.constant 0 : index
    %c0_0 = arith.constant 0 : index
    %0 = vector.load %arg1[%c0, %c0_0] : memref<128x1xi32, #tpu.memory_space<vmem>>, vector<128x1xi32>
    %c0_1 = arith.constant 0 : index
    %c0_2 = arith.constant 0 : index
    %1 = vector.load %arg2[%c0_1, %c0_2] : memref<128x1xi32, #tpu.memory_space<vmem>>, vector<128x1xi32>
    %2 = tpu.iota {dimensions = array<i32: 1>} : vector<128x12xi32>
    %3 = tpu.iota {dimensions = array<i32: 1>} : vector<128x16xi32>
    %4 = vector.broadcast %0 : vector<128x1xi32> to vector<128x12xi32>
    %5 = arith.cmpi eq, %4, %2 : vector<128x12xi32>
    %6 = arith.extui %5 : vector<128x12xi1> to vector<128x12xi32>
    %7 = arith.sitofp %6 : vector<128x12xi32> to vector<128x12xf32>
    %8 = vector.broadcast %1 : vector<128x1xi32> to vector<128x16xi32>
    %9 = arith.cmpi eq, %8, %3 : vector<128x16xi32>
    %10 = arith.extui %9 : vector<128x16xi1> to vector<128x16xi32>
    %11 = arith.sitofp %10 : vector<128x16xi32> to vector<128x16xf32>
    %c0_3 = arith.constant 0 : index
    %c0_4 = arith.constant 0 : index
    %12 = vector.load %arg3[%c0_3, %c0_4] : memref<12x32xf32, #tpu.memory_space<vmem>>, vector<12x32xf32>
    %cst = arith.constant dense<0.000000e+00> : vector<128x32xf32>
    %13 = tpu.matmul %7, %12, %cst {dimension_numbers = #tpu.dot_dimension_numbers<[1], [0], [0], [1], [0, 0, 1, 1], [], []>, precision = #tpu.contract_precision<fp32>} : vector<128x12xf32>, vector<12x32xf32>, vector<128x32xf32> -> vector<128x32xf32>
    %c0_5 = arith.constant 0 : index
    %c0_6 = arith.constant 0 : index
    %14 = vector.load %arg4[%c0_5, %c0_6] : memref<16x32xf32, #tpu.memory_space<vmem>>, vector<16x32xf32>
    %cst_7 = arith.constant dense<0.000000e+00> : vector<128x32xf32>
    %15 = tpu.matmul %11, %14, %cst_7 {dimension_numbers = #tpu.dot_dimension_numbers<[1], [0], [0], [1], [0, 0, 1, 1], [], []>, precision = #tpu.contract_precision<fp32>} : vector<128x16xf32>, vector<16x32xf32>, vector<128x32xf32> -> vector<128x32xf32>
    %16 = arith.mulf %13, %15 : vector<128x32xf32>
    %cst_8 = arith.constant 1.000000e+00 : f32
    %17 = vector.broadcast %cst_8 : f32 to vector<1x32xf32>
    %cst_9 = arith.constant dense<0.000000e+00> : vector<1x128xf32>
    %18 = tpu.matmul %17, %16, %cst_9 {dimension_numbers = #tpu.dot_dimension_numbers<[1], [1], [0], [0], [0, 0, 1, 0], [], []>, precision = #tpu.contract_precision<fp32>} : vector<1x32xf32>, vector<128x32xf32>, vector<1x128xf32> -> vector<1x128xf32>
    %c0_10 = arith.constant 0 : index
    %c0_11 = arith.constant 0 : index
    %c0_12 = arith.constant 0 : index
    %19 = vector.load %arg5[%c0_10, %c0_11, %c0_12] : memref<1x1x128xf32, #tpu.memory_space<vmem>>, vector<1x1x128xf32>
    %20 = vector.shape_cast %19 : vector<1x1x128xf32> to vector<1x128xf32>
    %21 = vector.shape_cast %18 : vector<1x128xf32> to vector<1x1x128xf32>
    tpu.vector_store %arg5[%c0_10, %c0_11, %c0_12], %21 {strides = array<i32>} : memref<1x1x128xf32, #tpu.memory_space<vmem>>, vector<1x1x128xf32>,
    return
  }
  func.func @transform_0(%arg0: i32) -> (i32, i32) {
    %c0_i32 = arith.constant 0 : i32
    %c0_i32_0 = arith.constant 0 : i32
    return %arg0, %c0_i32 : i32, i32
  }
  func.func @transform_1(%arg0: i32) -> (i32, i32) {
    %c0_i32 = arith.constant 0 : i32
    %c0_i32_0 = arith.constant 0 : i32
    return %arg0, %c0_i32 : i32, i32
  }
  func.func @transform_2(%arg0: i32) -> (i32, i32) {
    %c0_i32 = arith.constant 0 : i32
    %c0_i32_0 = arith.constant 0 : i32
    %c0_i32_1 = arith.constant 0 : i32
    return %c0_i32, %c0_i32_0 : i32, i32
  }
  func.func @transform_3(%arg0: i32) -> (i32, i32) {
    %c0_i32 = arith.constant 0 : i32
    %c0_i32_0 = arith.constant 0 : i32
    %c0_i32_1 = arith.constant 0 : i32
    return %c0_i32, %c0_i32_0 : i32, i32
  }
  func.func @transform_4(%arg0: i32) -> (i32, i32, i32) {
    %c0_i32 = arith.constant 0 : i32
    %c0_i32_0 = arith.constant 0 : i32
    %c0_i32_1 = arith.constant 0 : i32
    return %arg0, %c0_i32, %c0_i32_0 : i32, i32, i32
  }
}

</mosaic_0001>

<bundles_post_ra>
// kernel: tpu_custom_call.1
= control target key start
LH: loop header
LB: loop body
LE: loop exit
PB: predicated region body
PF: predicated region fallthrough
CT: control target
= control target key end

     0   :  { %v3469_v3 = vmov 0   ;;  %s3464_s0 = inlined_call_operand.vmem [shape: s32[128,1], index: 0, kind: input, shape index: {}]   ;;  %s3465_s1 = inlined_call_operand.vmem [shape: s32[128,1], index: 1, kind: input, shape index: {}]   ;;  %s3466_s2 = inlined_call_operand.vmem [shape: f32[12,32], index: 2, kind: input, shape index: {}]   ;;  %s3467_s3 = inlined_call_operand.vmem [shape: f32[16,32], index: 3, kind: input, shape index: {}]   ;;  %s3468_s4 = inlined_call_operand.hbm [shape: f32[1,1,128], index: 4, kind: output, shape index: {}]  }
   0x1   :  { %v32_v0 = vld [vmem:[%s3464_s0 + $0x70] sm:$0xff]  ;;  %v30_v1 = vld [vmem:[%s3464_s0 + $0x60] sm:$0xff]  ;;  %2165 = vset.pattern.permute.xlu2 %v3469_v3  ;;  %2164 = vset.pattern.permute.xlu1 %v3469_v3 }
   0x2   :  { %v18_v2 = vld [vmem:[%s3464_s0] sm:$0xff]  ;;  %2163 = vset.pattern.permute.xlu0 %v3469_v3  ;;  %95 = vperm.xlu1 %2164, %v32_v0  }
   0x3   :  { %89 = vperm.xlu0 %2163, %v30_v1   ;;  %53 = vperm.xlu2 %2165, %v18_v2  }
   0x4   :  { %9 = vsyncpa [#allocation3], 0  ;;  %v33_v4 = vld [vmem:[%s3464_s0 + $0x78] sm:$0xff]  ;;  %v31_v5 = vld [vmem:[%s3464_s0 + $0x68] sm:$0xff]  ;;  %vm295_vm0 = vcmask 1043456   ;;  %v50_v46 = vlaneseq  ;;  %vm246_vm1 = vcmask 97280  }
   0x5   :  { %v19_v6 = vld [vmem:[%s3464_s0 + $0x8] sm:$0xff]  ;;  %v21_v7 = vld [vmem:[%s3464_s0 + $0x18] sm:$0xff]  ;;  %v20_v8 = vld [vmem:[%s3464_s0 + $0x10] sm:$0xff]  ;;  %v2193_v49 = vmov 0.0   ;;  %s2015_s8 = sshll.u32 %s3468_s4, 4  ;;  %s2016_s8 = int_to_ptr.hbm [resolvable:$true] %s2015_s8 }
   0x6   :  { %v22_v9 = vld [vmem:[%s3464_s0 + $0x20] sm:$0xff]  ;;  %v24_v10 = vld [vmem:[%s3464_s0 + $0x30] sm:$0xff]  ;;  %v23_v11 = vld [vmem:[%s3464_s0 + $0x28] sm:$0xff]  ;;  %v2326_v47 = vand.u32 127, %v50_v46 }
   0x7   :  { %v25_v12 = vld [vmem:[%s3464_s0 + $0x38] sm:$0xff]  ;;  %v27_v13 = vld [vmem:[%s3464_s0 + $0x48] sm:$0xff]  ;;  %v26_v14 = vld [vmem:[%s3464_s0 + $0x40] sm:$0xff] }
   0x8   :  { %v28_v15 = vld [vmem:[%s3464_s0 + $0x50] sm:$0xff]  ;;  %v34_v16 = vld [vmem:[%s3465_s1] sm:$0xff]  ;;  %v29_v17 = vld [vmem:[%s3464_s0 + $0x58] sm:$0xff] }
   0x9   :  { %v35_v18 = vld [vmem:[%s3465_s1 + $0x8] sm:$0xff]  ;;  %v37_v19 = vld [vmem:[%s3465_s1 + $0x18] sm:$0xff]  ;;  %v36_v20 = vld [vmem:[%s3465_s1 + $0x10] sm:$0xff] }
   0xa   :  { %98 = vperm.xlu1 %2164, %v33_v4   ;;  %v38_v21 = vld [vmem:[%s3465_s1 + $0x20] sm:$0xff]  ;;  %v40_v22 = vld [vmem:[%s3465_s1 + $0x30] sm:$0xff]  ;;  %v39_v23 = vld [vmem:[%s3465_s1 + $0x28] sm:$0xff] }
   0xb   :  { %92 = vperm.xlu0 %2163, %v31_v5   ;;  %56 = vperm.xlu2 %2165, %v19_v6   ;;  %v41_v24 = vld [vmem:[%s3465_s1 + $0x38] sm:$0xff]  ;;  %v43_v25 = vld [vmem:[%s3465_s1 + $0x48] sm:$0xff]  ;;  %v42_v26 = vld [vmem:[%s3465_s1 + $0x40] sm:$0xff] }
   0xc   :  { %v44_v27 = vld [vmem:[%s3465_s1 + $0x50] sm:$0xff]  ;;  %v46_v28 = vld [vmem:[%s3465_s1 + $0x60] sm:$0xff]  ;;  %v45_v29 = vld [vmem:[%s3465_s1 + $0x58] sm:$0xff] }
   0xd   :  { %v47_v30 = vld [vmem:[%s3465_s1 + $0x68] sm:$0xff]  ;;  %v244_v34 = vld [vmem:[%s3466_s2] sm:$0xff]  ;;  %v49_v37 = vld [vmem:[%s3465_s1 + $0x78] sm:$0xff] }
   0xe   :  { %v245_v31 = vld [vmem:[%s3466_s2 + $0x8] sm:$0xf]  ;;  %v315_v36 = vand.u32 4294901760, %v244_v34  ;;  %v48_v40 = vld [vmem:[%s3465_s1 + $0x70] sm:$0xff] }
   0xf   :  { %v297_v32 = vsel %vm295_vm0, %v245_v31, 0 }
  0x10   :  { %v313_v33 = vand.u32 4294901760, %v297_v32  ;;  %v467_v39 = vsub.f32 %v244_v34, %v315_v36 }
  0x12   :  { %62 = vperm.xlu1 %2164, %v21_v7   ;;  %v461_v35 = vsub.f32 %v297_v32, %v313_v33  ;;  %314 = vmatpush.msra.mxu0 %v313_v33  ;;  %v468_v42 = vand.u32 4294901760, %v467_v39 }
  0x13   :  { %59 = vperm.xlu0 %2163, %v20_v8   ;;  %65 = vperm.xlu2 %2165, %v22_v9  }
  0x14   :  { %2155 = vmatpush.msra.mxu2 %v313_v33  ;;  %v462_v38 = vand.u32 4294901760, %v461_v35  ;;  %316 = vmatpush.msra.mxu0 %v315_v36  ;;  %v469_v44 = vsub.f32 %v467_v39, %v468_v42 }
  0x16   :  { %2156 = vmatpush.msra.mxu2 %v315_v36  ;;  %v463_v41 = vsub.f32 %v461_v35, %v462_v38  ;;  %770 = vmatpush.msrb.mxu0 %v462_v38  ;;  %v470_v45 = vand.u32 4294901760, %v469_v44 }
  0x18   :  { %553 = vmatpush.msrb.mxu2 %v461_v35  ;;  %v464_v43 = vand.u32 4294901760, %v463_v41  ;;  %774 = vmatpush.msrb.mxu0 %v468_v42 }
  0x1a   :  { %71 = vperm.xlu1 %2164, %v24_v10   ;;  %556 = vmatpush.msrb.mxu2 %v467_v39 }
  0x1b   :  { %68 = vperm.xlu0 %2163, %v23_v11   ;;  %74 = vperm.xlu2 %2165, %v25_v12  }
  0x1c   :  { %465 = vmatpush.msra.mxu1 %v464_v43  ;;  %2157 = vmatpush.msra.mxu3 %v464_v43 }
  0x1e   :  { %471 = vmatpush.msra.mxu1 %v470_v45  ;;  %2158 = vmatpush.msra.mxu3 %v470_v45 }
  0x20   :  { %653 = vmatpush.msrb.mxu3 %v313_v33  ;;  %855 = vmatpush.msrb.mxu1 %v313_v33 }
  0x22   :  { %80 = vperm.xlu1 %2164, %v27_v13   ;;  %655 = vmatpush.msrb.mxu3 %v315_v36 }
  0x23   :  { %77 = vperm.xlu0 %2163, %v26_v14   ;;  %83 = vperm.xlu2 %2165, %v28_v15  }
  0x24   :  { %857 = vmatpush.msrb.mxu1 %v315_v36 }
  0x2a   :  { %149 = vperm.xlu1 %2164, %v34_v16  }
  0x2b   :  { %86 = vperm.xlu0 %2163, %v29_v17   ;;  %152 = vperm.xlu2 %2165, %v35_v18  }
  0x32   :  { %158 = vperm.xlu1 %2164, %v37_v19  }
  0x33   :  { %155 = vperm.xlu0 %2163, %v36_v20   ;;  %161 = vperm.xlu2 %2165, %v38_v21  }
  0x3a   :  { %167 = vperm.xlu1 %2164, %v40_v22  }
  0x3b   :  { %164 = vperm.xlu0 %2163, %v39_v23   ;;  %170 = vperm.xlu2 %2165, %v41_v24  }
  0x42   :  { %176 = vperm.xlu1 %2164, %v43_v25  }
  0x43   :  { %173 = vperm.xlu0 %2163, %v42_v26   ;;  %179 = vperm.xlu2 %2165, %v44_v27  }
  0x4a   :  { %185 = vperm.xlu1 %2164, %v46_v28  }
  0x4b   :  { %182 = vperm.xlu0 %2163, %v45_v29   ;;  %188 = vperm.xlu2 %2165, %v47_v30  }
  0x52   :  { %194 = vperm.xlu1 %2164, %v49_v37  }
  0x53   :  { %191 = vperm.xlu0 %2163, %v48_v40  }
  0x5d   :  { %v54_v48 = vpop.permute.xlu2 %53 }
  0x5e   :  { %vm100_vm2 = vcmp.eq.s32.totalorder %v54_v48, %v2326_v47 }
  0x5f   :  { %v2330_v50 = vsel %vm100_vm2, 1.0, %v2193_v49 }
  0x60   :  { %v248_v51 = vsel %vm246_vm1, %v2330_v50, 0  ;;  %2056 = vmatmul.msk.f32.vlgmr.msra.gmra.mxu1 %vm246_vm1, %v2330_v50 }
  0x61   :  { %v2336_v52 = vsub.f32 %v248_v51, %v248_v51 }
  0x63   :  { %v319_v53 = vand.u32 4294901760, %v2336_v52 }
  0x65   :  { %v57_v54 = vpop.permute.xlu2 %56  ;;  %v320_v55 = vsub.f32 %v2336_v52, %v319_v53 }
  0x66   :  { %vm101_vm3 = vcmp.eq.s32.totalorder %v57_v54, %v2326_v47 }
  0x67   :  { %v2344_v56 = vsel %vm101_vm3, 1.0, %v2193_v49  ;;  %v321_v57 = vand.u32 4294901760, %v320_v55 }
  0x68   :  { %v251_v58 = vsel %vm246_vm1, %v2344_v56, 0  ;;  %2057 = vmatmul.msk.f32.gmra.mxu1 %vm246_vm1, %v2344_v56 }
  0x69   :  { %v2350_v59 = vsub.f32 %v251_v58, %v251_v58  ;;  %322 = vmatmul.f32.vlgmr.msra.gmra.mxu0 %v321_v57 }
  0x6b   :  { %v327_v60 = vand.u32 4294901760, %v2350_v59 }
  0x6d   :  { %v328_v61 = vsub.f32 %v2350_v59, %v327_v60  ;;  %v66_v21 = vpop.permute.xlu2 %65 }
  0x6e   :  { %vm104_vm10 = vcmp.eq.s32.totalorder %v66_v21, %v2326_v47 }
  0x6f   :  { %v329_v62 = vand.u32 4294901760, %v328_v61  ;;  %v2419_v30 = vsel %vm104_vm10, 1.0, %v2193_v49 }
  0x70   :  { %v260_v36 = vsel %vm246_vm1, %v2419_v30, 0 }
  0x71   :  { %330 = vmatmul.f32.gmra.mxu0 %v329_v62  ;;  %v2438_v42 = vsub.f32 %v260_v36, %v260_v36 }
  0x73   :  { %v351_v46 = vand.u32 4294901760, %v2438_v42 }
  0x74   :  { %v96_v63 = vpop.permute.xlu1 %95 }
  0x75   :  { %v90_v0 = vpop.permute.xlu0 %89  ;;  %vm114_vm5 = vcmp.eq.s32.totalorder %v96_v63, %v2326_v47  ;;  %v352_v57 = vsub.f32 %v2438_v42, %v351_v46 }
  0x76   :  { %vm112_vm4 = vcmp.eq.s32.totalorder %v90_v0, %v2326_v47  ;;  %v2369_v7 = vsel %vm114_vm5, 1.0, %v2193_v49 }
  0x77   :  { %v2358_v1 = vsel %vm112_vm4, 1.0, %v2193_v49  ;;  %v290_v12 = vsel %vm246_vm1, %v2369_v7, 0  ;;  %v353_v62 = vand.u32 4294901760, %v352_v57  ;;  %vm925_vm4 = vcmask 130048  }
  0x78   :  { %v284_v2 = vsel %vm246_vm1, %v2358_v1, 0  ;;  %2068 = vmatmul.msk.f32.vlgmr.msra.gmra.mxu3 %vm246_vm1, %v2358_v1  ;;  %v2387_v15 = vsub.f32 %v290_v12, %v290_v12 }
  0x79   :  { %v2364_v4 = vsub.f32 %v284_v2, %v284_v2 }
  0x7a   :  { %v431_v25 = vand.u32 4294901760, %v2387_v15 }
  0x7b   :  { %v415_v5 = vand.u32 4294901760, %v2364_v4 }
  0x7c   :  { %v99_v6 = vpop.permute.xlu1 %98  ;;  %v432_v34 = vsub.f32 %v2387_v15, %v431_v25 }
  0x7d   :  { %v93_v8 = vpop.permute.xlu0 %92  ;;  %v416_v9 = vsub.f32 %v2364_v4, %v415_v5  ;;  %vm115_vm7 = vcmp.eq.s32.totalorder %v99_v6, %v2326_v47 }
  0x7e   :  { %vm113_vm6 = vcmp.eq.s32.totalorder %v93_v8, %v2326_v47  ;;  %v2391_v18 = vsel %vm115_vm7, 1.0, %v2193_v49  ;;  %v433_v39 = vand.u32 4294901760, %v432_v34 }
  0x7f   :  { %v2376_v10 = vsel %vm113_vm6, 1.0, %v2193_v49  ;;  %v417_v11 = vand.u32 4294901760, %v416_v9  ;;  %v293_v26 = vsel %vm246_vm1, %v2391_v18, 0 }
  0x80   :  { %v287_v13 = vsel %vm246_vm1, %v2376_v10, 0  ;;  %2069 = vmatmul.msk.f32.gmra.mxu3 %vm246_vm1, %v2376_v10  ;;  %v2421_v31 = vsub.f32 %v293_v26, %v293_v26 }
  0x81   :  { %v2384_v14 = vsub.f32 %v287_v13, %v287_v13  ;;  %418 = vmatmul.f32.vlgmr.msra.gmra.mxu2 %v417_v11 }
  0x82   :  { %v439_v41 = vand.u32 4294901760, %v2421_v31 }
  0x83   :  { %v423_v16 = vand.u32 4294901760, %v2384_v14 }
  0x84   :  { %v63_v17 = vpop.permute.xlu1 %62  ;;  %v440_v44 = vsub.f32 %v2421_v31, %v439_v41 }
  0x85   :  { %vm103_vm8 = vcmp.eq.s32.totalorder %v63_v17, %v2326_v47  ;;  %v60_v19 = vpop.permute.xlu0 %59  ;;  %v424_v20 = vsub.f32 %v2384_v14, %v423_v16 }
  0x86   :  { %v2398_v22 = vsel %vm103_vm8, 1.0, %v2193_v49  ;;  %vm102_vm9 = vcmp.eq.s32.totalorder %v60_v19, %v2326_v47  ;;  %v441_v54 = vand.u32 4294901760, %v440_v44 }
  0x87   :  { %v2403_v23 = vsel %vm102_vm9, 1.0, %v2193_v49  ;;  %v425_v24 = vand.u32 4294901760, %v424_v20  ;;  %v257_v27 = vsel %vm246_vm1, %v2398_v22, 0 }
  0x88   :  { %v254_v28 = vsel %vm246_vm1, %v2403_v23, 0  ;;  %2058 = vmatmul.msk.f32.gmra.mxu1 %vm246_vm1, %v2403_v23  ;;  %2070 = vmatmul.msk.f32.gmra.mxu3 %vm246_vm1, %v2369_v7  ;;  %v2423_v32 = vsub.f32 %v257_v27, %v257_v27 }
  0x89   :  { %v2416_v29 = vsub.f32 %v254_v28, %v254_v28  ;;  %426 = vmatmul.f32.gmra.mxu2 %v425_v24 }
  0x8a   :  { %v343_v40 = vand.u32 4294901760, %v2423_v32 }
  0x8b   :  { %v335_v33 = vand.u32 4294901760, %v2416_v29 }
  0x8c   :  { %v344_v43 = vsub.f32 %v2423_v32, %v343_v40  ;;  %v72_v48 = vpop.permute.xlu1 %71 }
  0x8d   :  { %v336_v35 = vsub.f32 %v2416_v29, %v335_v33  ;;  %v69_v37 = vpop.permute.xlu0 %68  ;;  %vm106_vm12 = vcmp.eq.s32.totalorder %v72_v48, %v2326_v47 }
  0x8e   :  { %vm105_vm11 = vcmp.eq.s32.totalorder %v69_v37, %v2326_v47  ;;  %v345_v51 = vand.u32 4294901760, %v344_v43  ;;  %v2460_v61 = vsel %vm106_vm12, 1.0, %v2193_v49 }
  0x8f   :  { %v337_v38 = vand.u32 4294901760, %v336_v35  ;;  %v2446_v45 = vsel %vm105_vm11, 1.0, %v2193_v49  ;;  %v266_v0 = vsel %vm246_vm1, %v2460_v61, 0 }
  0x90   :  { %2059 = vmatmul.msk.f32.gmra.mxu1 %vm246_vm1, %v2398_v22  ;;  %2071 = vmatmul.msk.f32.gmra.mxu3 %vm246_vm1, %v2391_v18  ;;  %v263_v55 = vsel %vm246_vm1, %v2446_v45, 0  ;;  %v2471_v2 = vsub.f32 %v266_v0, %v266_v0 }
  0x91   :  { %338 = vmatmul.f32.gmra.mxu0 %v337_v38  ;;  %434 = vmatmul.f32.gmra.mxu2 %v433_v39  ;;  %v2457_v58 = vsub.f32 %v263_v55, %v263_v55 }
  0x92   :  { %v367_v12 = vand.u32 4294901760, %v2471_v2 }
  0x93   :  { %v359_v63 = vand.u32 4294901760, %v2457_v58 }
  0x94   :  { %v368_v13 = vsub.f32 %v2471_v2, %v367_v12  ;;  %v81_v19 = vpop.permute.xlu1 %80 }
  0x95   :  { %v360_v6 = vsub.f32 %v2457_v58, %v359_v63  ;;  %v78_v9 = vpop.permute.xlu0 %77  ;;  %vm109_vm15 = vcmp.eq.s32.totalorder %v81_v19, %v2326_v47 }
  0x96   :  { %vm108_vm14 = vcmp.eq.s32.totalorder %v78_v9, %v2326_v47  ;;  %v369_v20 = vand.u32 4294901760, %v368_v13  ;;  %v2499_v27 = vsel %vm109_vm15, 1.0, %v2193_v49 }
  0x97   :  { %v361_v11 = vand.u32 4294901760, %v360_v6  ;;  %v2488_v17 = vsel %vm108_vm14, 1.0, %v2193_v49  ;;  %v275_v34 = vsel %vm246_vm1, %v2499_v27, 0 }
  0x98   :  { %2060 = vmatmul.msk.f32.gmra.mxu1 %vm246_vm1, %v2419_v30  ;;  %659 = vmatmul.f32.vlgmr.msrb.gmra.mxu3 %v319_v53  ;;  %v75_v53 = vpop.permute.xlu2 %74  ;;  %v272_v24 = vsel %vm246_vm1, %v2488_v17, 0 }
  0x99   :  { %346 = vmatmul.f32.gmra.mxu0 %v345_v51  ;;  %442 = vmatmul.f32.gmra.mxu2 %v441_v54  ;;  %vm107_vm13 = vcmp.eq.s32.totalorder %v75_v53, %v2326_v47 }
  0x9a   :  { %v2475_v8 = vsel %vm107_vm13, 1.0, %v2193_v49 }
  0x9d   :  { %v87_v38 = vpop.permute.xlu0 %86 }
  0x9e   :  { %vm111_vm2 = vcmp.eq.s32.totalorder %v87_v38, %v2326_v47 }
  0x9f   :  { %v2520_v54 = vsel %vm111_vm2, 1.0, %v2193_v49 }
  0xa0   :  { %2061 = vmatmul.msk.f32.gmra.mxu1 %vm246_vm1, %v2446_v45  ;;  %665 = vmatmul.f32.gmra.mxu3 %v327_v60  ;;  %v269_v60 = vsel %vm246_vm1, %v2475_v8, 0  ;;  %v84_v35 = vpop.permute.xlu2 %83 }
  0xa1   :  { %354 = vmatmul.f32.gmra.mxu0 %v353_v62  ;;  %559 = vmatmul.f32.vlgmr.msrb.gmra.mxu2 %v2336_v52  ;;  %v2484_v52 = vsub.f32 %v269_v60, %v269_v60  ;;  %vm110_vm0 = vcmp.eq.s32.totalorder %v84_v35, %v2326_v47 }
  0xa2   :  { %v2508_v37 = vsel %vm110_vm0, 1.0, %v2193_v49 }
  0xa3   :  { %v375_v21 = vand.u32 4294901760, %v2484_v52  ;;  %v278_v43 = vsel %vm246_vm1, %v2508_v37, 0 }
  0xa5   :  { %v376_v26 = vsub.f32 %v2484_v52, %v375_v21 }
  0xa7   :  { %v377_v28 = vand.u32 4294901760, %v376_v26 }
  0xa8   :  { %2062 = vmatmul.msk.f32.gmra.mxu1 %vm246_vm1, %v2460_v61  ;;  %671 = vmatmul.f32.gmra.mxu3 %v335_v33 }
  0xa9   :  { %362 = vmatmul.f32.gmra.mxu0 %v361_v11  ;;  %564 = vmatmul.f32.gmra.mxu2 %v2350_v59  ;;  %v382_v59 = vsub.f32 %v272_v24, %v272_v24 }
  0xab   :  { %v383_v33 = vand.u32 4294901760, %v382_v59 }
  0xad   :  { %v384_v36 = vsub.f32 %v382_v59, %v383_v33 }
  0xaf   :  { %v385_v39 = vand.u32 4294901760, %v384_v36 }
  0xb0   :  { %2063 = vmatmul.msk.f32.gmra.mxu1 %vm246_vm1, %v2475_v8  ;;  %677 = vmatmul.f32.gmra.mxu3 %v343_v40 }
  0xb1   :  { %370 = vmatmul.f32.gmra.mxu0 %v369_v20  ;;  %569 = vmatmul.f32.gmra.mxu2 %v2416_v29  ;;  %v390_v29 = vsub.f32 %v275_v34, %v275_v34 }
  0xb3   :  { %v391_v40 = vand.u32 4294901760, %v390_v29 }
  0xb5   :  { %v392_v48 = vsub.f32 %v390_v29, %v391_v40 }
  0xb7   :  { %v393_v57 = vand.u32 4294901760, %v392_v48 }
  0xb8   :  { %2064 = vmatmul.msk.f32.gmra.mxu1 %vm246_vm1, %v2488_v17  ;;  %683 = vmatmul.f32.gmra.mxu3 %v351_v46  ;;  %v398_v46 = vsub.f32 %v278_v43, %v278_v43  ;;  %v156_v43 = vpop.permute.xlu0 %155 }
  0xb9   :  { %378 = vmatmul.f32.gmra.mxu0 %v377_v28  ;;  %574 = vmatmul.f32.gmra.mxu2 %v2423_v32  ;;  %v924_v32 = vld [vmem:[%s3467_s3 + $0x8] sm:$0xff]  ;;  %v150_v28 = vpop.permute.xlu1 %149  ;;  %vm198_vm6 = vcmp.eq.s32.totalorder %v156_v43, %v2326_v47 }
  0xba   :  { %v988_v44 = vand.u32 4294901760, %v924_v32  ;;  %v399_v62 = vand.u32 4294901760, %v398_v46  ;;  %vm196_vm3 = vcmp.eq.s32.totalorder %v150_v28, %v2326_v47 }
  0xbc   :  { %989 = vmatpush.msra.mxu2 %v988_v44  ;;  %v1136_v51 = vsub.f32 %v924_v32, %v988_v44  ;;  %1328 = vmatpush.msra.mxu1 %v988_v44  ;;  %v400_v6 = vsub.f32 %v398_v46, %v399_v62 }
  0xbe   :  { %v1137_v55 = vand.u32 4294901760, %v1136_v51  ;;  %1228 = vmatpush.msra.mxu0 %v1136_v51  ;;  %v401_v9 = vand.u32 4294901760, %v400_v6 }
  0xc0   :  { %2065 = vmatmul.msk.f32.gmra.mxu1 %vm246_vm1, %v2499_v27  ;;  %689 = vmatmul.f32.gmra.mxu3 %v359_v63  ;;  %v1138_v63 = vsub.f32 %v1136_v51, %v1137_v55  ;;  %v2628_v51 = vsel %vm198_vm6, 1.0, %v2193_v49 }
  0xc1   :  { %386 = vmatmul.f32.gmra.mxu0 %v385_v39  ;;  %579 = vmatmul.f32.gmra.mxu2 %v2438_v42  ;;  %v281_v42 = vsel %vm246_vm1, %v2520_v54, 0 }
  0xc2   :  { %v1139_v0 = vand.u32 4294901760, %v1138_v63  ;;  %v406_v53 = vsub.f32 %v281_v42, %v281_v42  ;;  %v933_v63 = vsel %vm925_vm4, %v2628_v51, 0 }
  0xc4   :  { %1140 = vmatpush.msra.mxu3 %v1139_v0  ;;  %v407_v11 = vand.u32 4294901760, %v406_v53  ;;  %v2646_v0 = vsub.f32 %v933_v63, %v933_v63 }
  0xc6   :  { %v408_v60 = vsub.f32 %v406_v53, %v407_v11 }
  0xc8   :  { %2066 = vmatmul.msk.f32.gmra.mxu1 %vm246_vm1, %v2508_v37  ;;  %695 = vmatmul.f32.gmra.mxu3 %v367_v12  ;;  %v409_v13 = vand.u32 4294901760, %v408_v60 }
  0xc9   :  { %394 = vmatmul.f32.gmra.mxu0 %v393_v57  ;;  %584 = vmatmul.f32.gmra.mxu2 %v2457_v58  ;;  %v923_v58 = vld [vmem:[%s3467_s3] sm:$0xff]  ;;  %s2195_s3 = smov [#allocation2]  }
  0xca   :  { %s2013_s5 = sshll.u32 %s2195_s3, 4  ;;  %s2014_s5 = int_to_ptr.vmem [resolvable:$true] %s2013_s5 }
  0xd0   :  { %2067 = vmatmul.msk.f32.gmra.mxu1 %vm246_vm1, %v2520_v54  ;;  %701 = vmatmul.f32.gmra.mxu3 %v375_v21 }
  0xd1   :  { %402 = vmatmul.f32.gmra.mxu0 %v401_v9  ;;  %589 = vmatmul.f32.gmra.mxu2 %v2471_v2  ;;  %v990_v2 = vand.u32 4294901760, %v923_v58 }
  0xd3   :  { %v1142_v12 = vsub.f32 %v923_v58, %v990_v2  ;;  %991 = vmatpush.msra.mxu2 %v990_v2  ;;  %1330 = vmatpush.msra.mxu1 %v990_v2 }
  0xd5   :  { %1231 = vmatpush.msra.mxu0 %v1142_v12  ;;  %1445 = vmatpush.msrb.mxu2 %v1137_v55 }
  0xd8   :  { %707 = vmatmul.f32.gmra.mxu3 %v383_v33  ;;  %2088 = vmatmul.msk.f32.vlgmr.msrb.gmra.mxu1 %vm246_vm1, %v2330_v50 }
  0xd9   :  { %410 = vmatmul.f32.gmra.mxu0 %v409_v13  ;;  %594 = vmatmul.f32.gmra.mxu2 %v2484_v52  ;;  %v1143_v52 = vand.u32 4294901760, %v1142_v12 }
  0xdb   :  { %1449 = vmatpush.msrb.mxu2 %v1143_v52 }
  0xe0   :  { %713 = vmatmul.f32.gmra.mxu3 %v391_v40  ;;  %2089 = vmatmul.msk.f32.gmra.mxu1 %vm246_vm1, %v2344_v56 }
  0xe1   :  { %599 = vmatmul.f32.gmra.mxu2 %v382_v59  ;;  %2072 = vmatmul.msk.f32.vlgmr.msrb.gmra.mxu0 %vm246_vm1, %v2330_v50  ;;  %v2548_v50 = vpop.f32.mrf.mxu1 }
  0xe8   :  { %719 = vmatmul.f32.gmra.mxu3 %v399_v62  ;;  %2090 = vmatmul.msk.f32.gmra.mxu1 %vm246_vm1, %v2403_v23 }
  0xe9   :  { %604 = vmatmul.f32.gmra.mxu2 %v390_v29  ;;  %2073 = vmatmul.msk.f32.gmra.mxu0 %vm246_vm1, %v2344_v56  ;;  %v1144_v56 = vsub.f32 %v1142_v12, %v1143_v52  ;;  %v2558_v21 = vpop.f32.mrf.mxu1  ;;  %v1010_v12 = vand.u32 4294901760, %v2646_v0 }
  0xeb   :  { %v1145_v19 = vand.u32 4294901760, %v1144_v56 }
  0xed   :  { %1146 = vmatpush.msra.mxu3 %v1145_v19 }
  0xef   :  { %1530 = vmatpush.msrb.mxu3 %v988_v44 }
  0xf0   :  { %725 = vmatmul.f32.gmra.mxu3 %v407_v11  ;;  %2091 = vmatmul.msk.f32.gmra.mxu1 %vm246_vm1, %v2398_v22 }
  0xf1   :  { %609 = vmatmul.f32.gmra.mxu2 %v398_v46  ;;  %2074 = vmatmul.msk.f32.gmra.mxu0 %vm246_vm1, %v2403_v23  ;;  %v2556_v23 = vpop.f32.mrf.mxu0 }
  0xf2   :  { %1532 = vmatpush.msrb.mxu3 %v990_v2 }
  0xf8   :  { %731 = vmatmul.f32.gmra.mxu3 %v415_v5  ;;  %2092 = vmatmul.msk.f32.gmra.mxu1 %vm246_vm1, %v2419_v30 }
  0xf9   :  { %614 = vmatmul.f32.gmra.mxu2 %v406_v53  ;;  %2075 = vmatmul.msk.f32.gmra.mxu0 %vm246_vm1, %v2398_v22  ;;  %v2567_v24 = vpop.f32.mrf.mxu0  ;;  %v475_v53 = vadd.f32 %v2548_v50, %v2556_v23 }
  0xfa   :  { %v479_v23 = vadd.f32 %v2558_v21, %v2567_v24 }
  0xfb   :  { %v522_v20 = vpop.f32.mrf.mxu3 }
 0x100   :  { %737 = vmatmul.f32.gmra.mxu3 %v423_v16  ;;  %2093 = vmatmul.msk.f32.gmra.mxu1 %vm246_vm1, %v2446_v45 }
 0x101   :  { %619 = vmatmul.f32.gmra.mxu2 %v2364_v4  ;;  %2076 = vmatmul.msk.f32.gmra.mxu0 %vm246_vm1, %v2419_v30  ;;  %v2582_v30 = vsel %vm196_vm3, 1.0, %v2193_v49 }
 0x103   :  { %v526_v5 = vpop.f32.mrf.mxu3 }
 0x104   :  { %v419_v22 = vpop.f32.mrf.mxu2 }
 0x105   :  { %v2569_v59 = vadd.f32 %v522_v20, %v419_v22  ;;  %v2571_v26 = vpop.f32.mrf.mxu1 }
 0x108   :  { %743 = vmatmul.f32.gmra.mxu3 %v431_v25  ;;  %2094 = vmatmul.msk.f32.gmra.mxu1 %vm246_vm1, %v2460_v61 }
 0x109   :  { %624 = vmatmul.f32.gmra.mxu2 %v2384_v14  ;;  %2077 = vmatmul.msk.f32.gmra.mxu0 %vm246_vm1, %v2446_v45  ;;  %v927_v14 = vsel %vm925_vm4, %v2582_v30, 0  ;;  %v153_v45 = vpop.permute.xlu2 %152 }
 0x10a   :  { %vm197_vm5 = vcmp.eq.s32.totalorder %v153_v45, %v2326_v47  ;;  %v2600_v35 = vsub.f32 %v927_v14, %v927_v14  ;;  %v165_v14 = vpop.permute.xlu0 %164 }
 0x10b   :  { %v530_v4 = vpop.f32.mrf.mxu3  ;;  %v2603_v38 = vsel %vm197_vm5, 1.0, %v2193_v49  ;;  %vm201_vm9 = vcmp.eq.s32.totalorder %v165_v14, %v2326_v47 }
 0x10c   :  { %v427_v16 = vpop.f32.mrf.mxu2 }
 0x10d   :  { %v2584_v33 = vadd.f32 %v526_v5, %v427_v16  ;;  %v2586_v34 = vpop.f32.mrf.mxu1  ;;  %v1011_v5 = vsub.f32 %v2646_v0, %v1010_v12 }
 0x10e   :  { %v2588_v25 = vpop.f32.mrf.mxu0 }
 0x10f   :  { %v1012_v45 = vand.u32 4294901760, %v1011_v5  ;;  %v483_v43 = vadd.f32 %v2571_v26, %v2588_v25 }
 0x110   :  { %749 = vmatmul.f32.gmra.mxu3 %v439_v41  ;;  %2095 = vmatmul.msk.f32.gmra.mxu1 %vm246_vm1, %v2475_v8 }
 0x111   :  { %629 = vmatmul.f32.gmra.mxu2 %v2387_v15  ;;  %2078 = vmatmul.msk.f32.gmra.mxu0 %vm246_vm1, %v2460_v61  ;;  %v994_v15 = vand.u32 4294901760, %v2600_v35  ;;  %v930_v61 = vsel %vm925_vm4, %v2603_v38, 0  ;;  %v162_v56 = vpop.permute.xlu2 %161 }
 0x112   :  { %v2622_v32 = vsub.f32 %v930_v61, %v930_v61  ;;  %vm200_vm8 = vcmp.eq.s32.totalorder %v162_v56, %v2326_v47 }
 0x113   :  { %v534_v29 = vpop.f32.mrf.mxu3  ;;  %v995_v46 = vsub.f32 %v2600_v35, %v994_v15  ;;  %v2680_v28 = vsel %vm200_vm8, 1.0, %v2193_v49 }
 0x114   :  { %v435_v36 = vpop.f32.mrf.mxu2  ;;  %v1002_v42 = vand.u32 4294901760, %v2622_v32  ;;  %v939_v21 = vsel %vm925_vm4, %v2680_v28, 0 }
 0x115   :  { %v2605_v39 = vadd.f32 %v530_v4, %v435_v36  ;;  %v2607_v41 = vpop.f32.mrf.mxu1  ;;  %v996_v62 = vand.u32 4294901760, %v995_v46  ;;  %v2698_v24 = vsub.f32 %v939_v21, %v939_v21 }
 0x116   :  { %v2609_v40 = vpop.f32.mrf.mxu0  ;;  %v1003_v9 = vsub.f32 %v2622_v32, %v1002_v42 }
 0x118   :  { %2096 = vmatmul.msk.f32.gmra.mxu1 %vm246_vm1, %v2488_v17  ;;  %2104 = vmatmul.msk.f32.vlgmr.msra.gmra.mxu3 %vm925_vm4, %v2582_v30  ;;  %v1004_v2 = vand.u32 4294901760, %v1003_v9 }
 0x119   :  { %634 = vmatmul.f32.gmra.mxu2 %v2421_v31  ;;  %2079 = vmatmul.msk.f32.gmra.mxu0 %vm246_vm1, %v2475_v8  ;;  %v159_v8 = vpop.permute.xlu1 %158 }
 0x11a   :  { %vm199_vm7 = vcmp.eq.s32.totalorder %v159_v8, %v2326_v47 }
 0x11b   :  { %v660_v44 = vpop.f32.mrf.mxu3  ;;  %v2654_v60 = vsel %vm199_vm7, 1.0, %v2193_v49 }
 0x11c   :  { %v443_v48 = vpop.f32.mrf.mxu2  ;;  %v936_v50 = vsel %vm925_vm4, %v2654_v60, 0 }
 0x11d   :  { %v2630_v55 = vadd.f32 %v534_v29, %v443_v48  ;;  %v2632_v57 = vpop.f32.mrf.mxu1  ;;  %v2672_v19 = vsub.f32 %v936_v50, %v936_v50  ;;  %v2706_v48 = vsel %vm201_vm9, 1.0, %v2193_v49 }
 0x11e   :  { %v2634_v31 = vpop.f32.mrf.mxu0  ;;  %v942_v26 = vsel %vm925_vm4, %v2706_v48, 0 }
 0x11f   :  { %v1018_v29 = vand.u32 4294901760, %v2672_v19  ;;  %v2724_v25 = vsub.f32 %v942_v26, %v942_v26 }
 0x120   :  { %2097 = vmatmul.msk.f32.gmra.mxu1 %vm246_vm1, %v2499_v27  ;;  %2105 = vmatmul.msk.f32.gmra.mxu3 %vm925_vm4, %v2603_v38 }
 0x121   :  { %2080 = vmatmul.msk.f32.gmra.mxu0 %vm246_vm1, %v2488_v17  ;;  %997 = vmatmul.f32.vlgmr.msra.gmra.mxu2 %v996_v62  ;;  %v168_v63 = vpop.permute.xlu1 %167 }
 0x122   :  { %vm202_vm10 = vcmp.eq.s32.totalorder %v168_v63, %v2326_v47  ;;  %v174_v63 = vpop.permute.xlu0 %173 }
 0x123   :  { %v666_v6 = vpop.f32.mrf.mxu3  ;;  %v2732_v56 = vsel %vm202_vm10, 1.0, %v2193_v49  ;;  %vm204_vm12 = vcmp.eq.s32.totalorder %v174_v63, %v2326_v47 }
 0x124   :  { %v560_v11 = vpop.f32.mrf.mxu2 }
 0x125   :  { %v561_v13 = vadd.f32 %v560_v11, %v475_v53  ;;  %v2656_v58 = vpop.f32.mrf.mxu1  ;;  %v487_v11 = vadd.f32 %v2586_v34, %v2609_v40  ;;  %v945_v34 = vsel %vm925_vm4, %v2732_v56, 0  ;;  %v171_v40 = vpop.permute.xlu2 %170 }
 0x126   :  { %v2658_v17 = vpop.f32.mrf.mxu0  ;;  %vm203_vm11 = vcmp.eq.s32.totalorder %v171_v40, %v2326_v47  ;;  %v2750_v14 = vsub.f32 %v945_v34, %v945_v34 }
 0x127   :  { %v2661_v52 = vadd.f32 %v660_v44, %v561_v13  ;;  %v1019_v44 = vsub.f32 %v2672_v19, %v1018_v29 }
 0x128   :  { %2098 = vmatmul.msk.f32.gmra.mxu1 %vm246_vm1, %v2508_v37  ;;  %2106 = vmatmul.msk.f32.gmra.mxu3 %vm925_vm4, %v2628_v51  ;;  %v3471_v26 = vand.u32 4294901760, %v2750_v14 }
 0x129   :  { %2081 = vmatmul.msk.f32.gmra.mxu0 %vm246_vm1, %v2499_v27  ;;  %1005 = vmatmul.f32.gmra.mxu2 %v1004_v2  ;;  %v1020_v53 = vand.u32 4294901760, %v1019_v44  ;;  %v2758_v44 = vsel %vm203_vm11, 1.0, %v2193_v49 }
 0x12b   :  { %v672_v20 = vpop.f32.mrf.mxu3 }
 0x12c   :  { %v565_v22 = vpop.f32.mrf.mxu2 }
 0x12d   :  { %v566_v4 = vadd.f32 %v565_v22, %v479_v23  ;;  %v2682_v16 = vpop.f32.mrf.mxu1  ;;  %v1034_v22 = vand.u32 4294901760, %v2724_v25 }
 0x12e   :  { %v2684_v27 = vpop.f32.mrf.mxu0 }
 0x12f   :  { %v2687_v36 = vadd.f32 %v666_v6, %v566_v4  ;;  %v1026_v6 = vand.u32 4294901760, %v2698_v24 }
 0x130   :  { %2099 = vmatmul.msk.f32.gmra.mxu1 %vm246_vm1, %v2520_v54  ;;  %2107 = vmatmul.msk.f32.gmra.mxu3 %vm925_vm4, %v2654_v60 }
 0x131   :  { %2082 = vmatmul.msk.f32.gmra.mxu0 %vm246_vm1, %v2508_v37  ;;  %1013 = vmatmul.f32.gmra.mxu2 %v1012_v45  ;;  %v1027_v2 = vsub.f32 %v2698_v24, %v1026_v6  ;;  %v491_v45 = vadd.f32 %v2607_v41, %v2634_v31  ;;  %v948_v41 = vsel %vm925_vm4, %v2758_v44, 0 }
 0x132   :  { %v2776_v31 = vsub.f32 %v948_v41, %v948_v41 }
 0x133   :  { %v678_v61 = vpop.f32.mrf.mxu3  ;;  %v1028_v5 = vand.u32 4294901760, %v1027_v2 }
 0x134   :  { %v570_v46 = vpop.f32.mrf.mxu2 }
 0x135   :  { %v571_v8 = vadd.f32 %v570_v46, %v483_v43  ;;  %v2708_v62 = vpop.f32.mrf.mxu1  ;;  %v1035_v43 = vsub.f32 %v2724_v25, %v1034_v22 }
 0x136   :  { %v2710_v37 = vpop.f32.mrf.mxu0 }
 0x137   :  { %v2713_v9 = vadd.f32 %v672_v20, %v571_v8 }
 0x138   :  { %2100 = vmatmul.msk.f32.gmra.mxu1 %vm246_vm1, %v2358_v1  ;;  %2108 = vmatmul.msk.f32.gmra.mxu3 %vm925_vm4, %v2680_v28 }
 0x139   :  { %2083 = vmatmul.msk.f32.gmra.mxu0 %vm246_vm1, %v2520_v54  ;;  %1021 = vmatmul.f32.gmra.mxu2 %v1020_v53  ;;  %v1036_v53 = vand.u32 4294901760, %v1035_v43 }
 0x13b   :  { %v684_v13 = vpop.f32.mrf.mxu3 }
 0x13c   :  { %v575_v50 = vpop.f32.mrf.mxu2 }
 0x13d   :  { %v576_v23 = vadd.f32 %v575_v50, %v487_v11  ;;  %v2734_v20 = vpop.f32.mrf.mxu1  ;;  %v1043_v50 = vsub.f32 %v2750_v14, %v3471_v26 }
 0x13e   :  { %v2736_v54 = vpop.f32.mrf.mxu0 }
 0x13f   :  { %v2739_v4 = vadd.f32 %v678_v61, %v576_v23  ;;  %v1044_v43 = vand.u32 4294901760, %v1043_v50 }
 0x140   :  { %2101 = vmatmul.msk.f32.gmra.mxu1 %vm246_vm1, %v2376_v10  ;;  %2109 = vmatmul.msk.f32.gmra.mxu3 %vm925_vm4, %v2706_v48 }
 0x141   :  { %2084 = vmatmul.msk.f32.gmra.mxu0 %vm246_vm1, %v2358_v1  ;;  %1029 = vmatmul.f32.gmra.mxu2 %v1028_v5  ;;  %v2784_v5 = vsel %vm204_vm12, 1.0, %v2193_v49 }
 0x143   :  { %v690_v21 = vpop.f32.mrf.mxu3 }
 0x144   :  { %v580_v61 = vpop.f32.mrf.mxu2 }
 0x145   :  { %v581_v46 = vadd.f32 %v580_v61, %v491_v45  ;;  %v2760_v8 = vpop.f32.mrf.mxu1  ;;  %v177_v45 = vpop.permute.xlu1 %176  ;;  %v3470_v61 = vand.u32 4294901760, %v2776_v31 }
 0x146   :  { %v2762_v1 = vpop.f32.mrf.mxu0  ;;  %vm205_vm13 = vcmp.eq.s32.totalorder %v177_v45, %v2326_v47 }
 0x147   :  { %v2765_v11 = vadd.f32 %v684_v13, %v581_v46  ;;  %v495_v13 = vadd.f32 %v2632_v57, %v2658_v17  ;;  %v951_v57 = vsel %vm925_vm4, %v2784_v5, 0 }
 0x148   :  { %2102 = vmatmul.msk.f32.gmra.mxu1 %vm246_vm1, %v2369_v7  ;;  %2110 = vmatmul.msk.f32.gmra.mxu3 %vm925_vm4, %v2732_v56  ;;  %v2802_v17 = vsub.f32 %v951_v57, %v951_v57 }
 0x149   :  { %2085 = vmatmul.msk.f32.gmra.mxu0 %vm246_vm1, %v2376_v10  ;;  %1037 = vmatmul.f32.gmra.mxu2 %v1036_v53  ;;  %v1051_v53 = vsub.f32 %v2776_v31, %v3470_v61 }
 0x14b   :  { %v696_v2 = vpop.f32.mrf.mxu3  ;;  %v1052_v45 = vand.u32 4294901760, %v1051_v53 }
 0x14c   :  { %v585_v23 = vpop.f32.mrf.mxu2 }
 0x14d   :  { %v586_v34 = vadd.f32 %v585_v23, %v495_v13  ;;  %v2786_v40 = vpop.f32.mrf.mxu1  ;;  %v2810_v13 = vsel %vm205_vm13, 1.0, %v2193_v49 }
 0x14e   :  { %v2788_v10 = vpop.f32.mrf.mxu0 }
 0x14f   :  { %v2791_v46 = vadd.f32 %v690_v21, %v586_v34  ;;  %v499_v21 = vadd.f32 %v2656_v58, %v2684_v27  ;;  %v180_v34 = vpop.permute.xlu2 %179  ;;  %v954_v58 = vsel %vm925_vm4, %v2810_v13, 0 }
 0x150   :  { %2103 = vmatmul.msk.f32.gmra.mxu1 %vm246_vm1, %v2391_v18  ;;  %2111 = vmatmul.msk.f32.gmra.mxu3 %vm925_vm4, %v2758_v44  ;;  %vm206_vm14 = vcmp.eq.s32.totalorder %v180_v34, %v2326_v47  ;;  %v2826_v27 = vsub.f32 %v954_v58, %v954_v58 }
 0x151   :  { %2086 = vmatmul.msk.f32.gmra.mxu0 %vm246_vm1, %v2369_v7  ;;  %1045 = vmatmul.f32.gmra.mxu2 %v1044_v43  ;;  %v1058_v43 = vand.u32 4294901760, %v2802_v17 }
 0x152   :  { %v1066_v61 = vand.u32 4294901760, %v2826_v27 }
 0x153   :  { %v702_v63 = vpop.f32.mrf.mxu3  ;;  %v1059_v53 = vsub.f32 %v2802_v17, %v1058_v43 }
 0x154   :  { %v590_v41 = vpop.f32.mrf.mxu2 }
 0x155   :  { %v591_v50 = vadd.f32 %v590_v41, %v499_v21  ;;  %v860_v23 = vpop.f32.mrf.mxu1  ;;  %v1060_v58 = vand.u32 4294901760, %v1059_v53  ;;  %v1067_v53 = vsub.f32 %v2826_v27, %v1066_v61 }
 0x156   :  { %v2812_v7 = vpop.f32.mrf.mxu0 }
 0x157   :  { %v2815_v57 = vadd.f32 %v696_v2, %v591_v50  ;;  %v503_v2 = vadd.f32 %v2682_v16, %v2710_v37  ;;  %v2834_v50 = vsel %vm206_vm14, 1.0, %v2193_v49 }
 0x158   :  { %2112 = vmatmul.msk.f32.gmra.mxu3 %vm925_vm4, %v2784_v5  ;;  %1334 = vmatmul.f32.vlgmr.msra.gmra.mxu1 %v994_v15  ;;  %v957_v16 = vsel %vm925_vm4, %v2834_v50, 0 }
 0x159   :  { %2087 = vmatmul.msk.f32.gmra.mxu0 %vm246_vm1, %v2391_v18  ;;  %1053 = vmatmul.f32.gmra.mxu2 %v1052_v45  ;;  %v183_v45 = vpop.permute.xlu0 %182 }
 0x15a   :  { %vm207_vm1 = vcmp.eq.s32.totalorder %v183_v45, %v2326_v47 }
 0x15b   :  { %v708_v21 = vpop.f32.mrf.mxu3 }
 0x15c   :  { %v595_v41 = vpop.f32.mrf.mxu2 }
 0x15d   :  { %v596_v15 = vadd.f32 %v595_v41, %v503_v2  ;;  %v864_v3 = vpop.f32.mrf.mxu1 }
 0x15e   :  { %v777_v18 = vpop.f32.mrf.mxu0 }
 0x15f   :  { %v778_v34 = vadd.f32 %v777_v18, %v2661_v52  ;;  %v2838_v26 = vadd.f32 %v702_v63, %v596_v15  ;;  %v2850_v52 = vsub.f32 %v957_v16, %v957_v16  ;;  %v507_v63 = vadd.f32 %v2708_v62, %v2736_v54 }
 0x160   :  { %2113 = vmatmul.msk.f32.gmra.mxu3 %vm925_vm4, %v2810_v13  ;;  %1340 = vmatmul.f32.gmra.mxu1 %v1002_v42  ;;  %v2858_v42 = vsel %vm207_vm1, 1.0, %v2193_v49 }
 0x161   :  { %v2846_v37 = vadd.f32 %v860_v23, %v778_v34  ;;  %1061 = vmatmul.f32.gmra.mxu2 %v1060_v58  ;;  %1234 = vmatmul.f32.vlgmr.msra.gmra.mxu0 %v2600_v35  ;;  %v186_v35 = vpop.permute.xlu1 %185  ;;  %v1068_v34 = vand.u32 4294901760, %v1067_v53  ;;  %v1074_v58 = vand.u32 4294901760, %v2850_v52  ;;  %v960_v62 = vsel %vm925_vm4, %v2858_v42, 0 }
 0x162   :  { %vm208_vm15 = vcmp.eq.s32.totalorder %v186_v35, %v2326_v47 }
 0x163   :  { %v714_v2 = vpop.f32.mrf.mxu3  ;;  %v1075_v53 = vsub.f32 %v2850_v52, %v1074_v58 }
 0x164   :  { %v600_v41 = vpop.f32.mrf.mxu2 }
 0x165   :  { %v601_v23 = vadd.f32 %v600_v41, %v507_v63  ;;  %v868_v15 = vpop.f32.mrf.mxu1 }
 0x166   :  { %v781_v18 = vpop.f32.mrf.mxu0 }
 0x167   :  { %v782_v45 = vadd.f32 %v781_v18, %v2687_v36  ;;  %v2862_v16 = vadd.f32 %v708_v21, %v601_v23  ;;  %v2874_v36 = vsub.f32 %v960_v62, %v960_v62  ;;  %v511_v21 = vadd.f32 %v2734_v20, %v2762_v1 }
 0x168   :  { %2114 = vmatmul.msk.f32.gmra.mxu3 %vm925_vm4, %v2834_v50  ;;  %1346 = vmatmul.f32.gmra.mxu1 %v1010_v12  ;;  %v2882_v12 = vsel %vm208_vm15, 1.0, %v2193_v49 }
 0x169   :  { %v2870_v54 = vadd.f32 %v864_v3, %v782_v45  ;;  %1069 = vmatmul.f32.gmra.mxu2 %v1068_v34  ;;  %1239 = vmatmul.f32.gmra.mxu0 %v2622_v32  ;;  %v189_v32 = vpop.permute.xlu2 %188  ;;  %v1076_v45 = vand.u32 4294901760, %v1075_v53  ;;  %v1082_v34 = vand.u32 4294901760, %v2874_v36  ;;  %v963_v20 = vsel %vm925_vm4, %v2882_v12, 0 }
 0x16a   :  { %vm209_vm0 = vcmp.eq.s32.totalorder %v189_v32, %v2326_v47 }
 0x16b   :  { %v720_v63 = vpop.f32.mrf.mxu3  ;;  %v1083_v53 = vsub.f32 %v2874_v36, %v1082_v34 }
 0x16c   :  { %v605_v41 = vpop.f32.mrf.mxu2 }
 0x16d   :  { %v606_v3 = vadd.f32 %v605_v41, %v511_v21  ;;  %v872_v23 = vpop.f32.mrf.mxu1 }
 0x16e   :  { %v785_v18 = vpop.f32.mrf.mxu0 }
 0x16f   :  { %v786_v35 = vadd.f32 %v785_v18, %v2713_v9  ;;  %v2886_v62 = vadd.f32 %v714_v2, %v606_v3  ;;  %v2898_v9 = vsub.f32 %v963_v20, %v963_v20  ;;  %v515_v2 = vadd.f32 %v2760_v8, %v2788_v10 }
 0x170   :  { %2115 = vmatmul.msk.f32.gmra.mxu3 %vm925_vm4, %v2858_v42  ;;  %1352 = vmatmul.f32.gmra.mxu1 %v1018_v29  ;;  %v2906_v29 = vsel %vm209_vm0, 1.0, %v2193_v49 }
 0x171   :  { %v2894_v1 = vadd.f32 %v868_v15, %v786_v35  ;;  %1077 = vmatmul.f32.gmra.mxu2 %v1076_v45  ;;  %1244 = vmatmul.f32.gmra.mxu0 %v2646_v0  ;;  %v192_v0 = vpop.permute.xlu0 %191  ;;  %v1084_v35 = vand.u32 4294901760, %v1083_v53  ;;  %v1090_v45 = vand.u32 4294901760, %v2898_v9  ;;  %v966_v8 = vsel %vm925_vm4, %v2906_v29, 0 }
 0x172   :  { %vm210_vm2 = vcmp.eq.s32.totalorder %v192_v0, %v2326_v47 }
 0x173   :  { %v726_v21 = vpop.f32.mrf.mxu3  ;;  %v1091_v53 = vsub.f32 %v2898_v9, %v1090_v45 }
 0x174   :  { %v610_v41 = vpop.f32.mrf.mxu2 }
 0x175   :  { %v611_v15 = vadd.f32 %v610_v41, %v515_v2  ;;  %v876_v3 = vpop.f32.mrf.mxu1 }
 0x176   :  { %v789_v18 = vpop.f32.mrf.mxu0 }
 0x177   :  { %v790_v32 = vadd.f32 %v789_v18, %v2739_v4  ;;  %v2910_v20 = vadd.f32 %v720_v63, %v611_v15  ;;  %v2922_v4 = vsub.f32 %v966_v8, %v966_v8  ;;  %v519_v63 = vadd.f32 %v2786_v40, %v2812_v7 }
 0x178   :  { %2116 = vmatmul.msk.f32.gmra.mxu3 %vm925_vm4, %v2882_v12  ;;  %1358 = vmatmul.f32.gmra.mxu1 %v1026_v6  ;;  %v2930_v6 = vsel %vm210_vm2, 1.0, %v2193_v49 }
 0x179   :  { %v2918_v10 = vadd.f32 %v872_v23, %v790_v32  ;;  %1085 = vmatmul.f32.gmra.mxu2 %v1084_v35  ;;  %1249 = vmatmul.f32.gmra.mxu0 %v2672_v19  ;;  %v195_v19 = vpop.permute.xlu1 %194  ;;  %v1092_v32 = vand.u32 4294901760, %v1091_v53  ;;  %v1098_v35 = vand.u32 4294901760, %v2922_v4  ;;  %v969_v40 = vsel %vm925_vm4, %v2930_v6, 0 }
 0x17a   :  { %vm211_vm3 = vcmp.eq.s32.totalorder %v195_v19, %v2326_v47 }
 0x17b   :  { %v732_v2 = vpop.f32.mrf.mxu3 }
 0x17c   :  { %v615_v41 = vpop.f32.mrf.mxu2 }
 0x17d   :  { %v616_v23 = vadd.f32 %v615_v41, %v519_v63  ;;  %v880_v15 = vpop.f32.mrf.mxu1  ;;  %v1099_v63 = vsub.f32 %v2922_v4, %v1098_v35  ;;  %v2952_v41 = vsel %vm211_vm3, 1.0, %v2193_v49  ;;  %v3472_v49 = vand.u32 4294901760, %v2750_v14 }
 0x17e   :  { %v793_v18 = vpop.f32.mrf.mxu0 }
 0x17f   :  { %v794_v0 = vadd.f32 %v793_v18, %v2765_v11  ;;  %v2934_v8 = vadd.f32 %v726_v21, %v616_v23  ;;  %v2946_v11 = vsub.f32 %v969_v40, %v969_v40 }
 0x180   :  { %2117 = vmatmul.msk.f32.gmra.mxu3 %vm925_vm4, %v2906_v29  ;;  %1364 = vmatmul.f32.gmra.mxu1 %v1034_v22 }
 0x181   :  { %v2942_v7 = vadd.f32 %v876_v3, %v794_v0  ;;  %1093 = vmatmul.f32.gmra.mxu2 %v1092_v32  ;;  %1254 = vmatmul.f32.gmra.mxu0 %v2698_v24  ;;  %v1100_v24 = vand.u32 4294901760, %v1099_v63  ;;  %v1106_v47 = vand.u32 4294901760, %v2946_v11  ;;  %v972_v0 = vsel %vm925_vm4, %v2952_v41, 0 }
 0x183   :  { %v738_v21 = vpop.f32.mrf.mxu3 }
 0x184   :  { %v620_v53 = vpop.f32.mrf.mxu2 }
 0x185   :  { %v621_v22 = vadd.f32 %v620_v53, %v2569_v59  ;;  %v884_v3 = vpop.f32.mrf.mxu1  ;;  %v2968_v59 = vsub.f32 %v972_v0, %v972_v0 }
 0x186   :  { %v797_v23 = vpop.f32.mrf.mxu0 }
 0x187   :  { %v798_v18 = vadd.f32 %v797_v23, %v2791_v46  ;;  %v2957_v19 = vadd.f32 %v732_v2, %v621_v22  ;;  %v1107_v2 = vsub.f32 %v2946_v11, %v1106_v47 }
 0x188   :  { %2118 = vmatmul.msk.f32.gmra.mxu3 %vm925_vm4, %v2930_v6  ;;  %1370 = vmatmul.f32.gmra.mxu1 %v3472_v49 }
 0x189   :  { %v2965_v32 = vadd.f32 %v880_v15, %v798_v18  ;;  %1101 = vmatmul.f32.gmra.mxu2 %v1100_v24  ;;  %1259 = vmatmul.f32.gmra.mxu0 %v2724_v25  ;;  %v1108_v49 = vand.u32 4294901760, %v1107_v2  ;;  %v1114_v15 = vand.u32 4294901760, %v2968_v59  ;;  %v3473_v25 = vand.u32 4294901760, %v2776_v31 }
 0x18b   :  { %v744_v46 = vpop.f32.mrf.mxu3 }
 0x18c   :  { %v625_v40 = vpop.f32.mrf.mxu2 }
 0x18d   :  { %v626_v63 = vadd.f32 %v625_v40, %v2584_v33  ;;  %v888_v53 = vpop.f32.mrf.mxu1 }
 0x18e   :  { %v801_v22 = vpop.f32.mrf.mxu0 }
 0x18f   :  { %v802_v23 = vadd.f32 %v801_v22, %v2815_v57  ;;  %v2976_v18 = vadd.f32 %v738_v21, %v626_v63  ;;  %v1115_v57 = vsub.f32 %v2968_v59, %v1114_v15 }
 0x190   :  { %2119 = vmatmul.msk.f32.gmra.mxu3 %vm925_vm4, %v2952_v41  ;;  %1376 = vmatmul.f32.gmra.mxu1 %v3473_v25 }
 0x191   :  { %v2982_v24 = vadd.f32 %v884_v3, %v802_v23  ;;  %1109 = vmatmul.f32.gmra.mxu2 %v1108_v49  ;;  %1264 = vmatmul.f32.gmra.mxu0 %v2750_v14  ;;  %v1116_v22 = vand.u32 4294901760, %v1115_v57 }
 0x193   :  { %v750_v33 = vpop.f32.mrf.mxu3 }
 0x194   :  { %v630_v0 = vpop.f32.mrf.mxu2 }
 0x195   :  { %v631_v21 = vadd.f32 %v630_v0, %v2605_v39  ;;  %v2989_v2 = vpop.f32.mrf.mxu1 }
 0x196   :  { %v805_v40 = vpop.f32.mrf.mxu0 }
 0x197   :  { %v806_v63 = vadd.f32 %v805_v40, %v2838_v26  ;;  %v2992_v25 = vadd.f32 %v744_v46, %v631_v21 }
 0x198   :  { %1382 = vmatmul.f32.gmra.mxu1 %v1058_v43  ;;  %2136 = vmatmul.msk.f32.vlgmr.msrb.gmra.mxu3 %vm925_vm4, %v2582_v30 }
 0x199   :  { %v2998_v14 = vadd.f32 %v888_v53, %v806_v63  ;;  %1117 = vmatmul.f32.gmra.mxu2 %v1116_v22  ;;  %1269 = vmatmul.f32.gmra.mxu0 %v2776_v31 }
 0x19b   :  { %v1149_v39 = vpop.f32.mrf.mxu3 }
 0x19c   :  { %v635_v3 = vpop.f32.mrf.mxu2 }
 0x19d   :  { %v636_v23 = vadd.f32 %v635_v3, %v2630_v55  ;;  %v3002_v49 = vpop.f32.mrf.mxu1 }
 0x19e   :  { %v3004_v26 = vpop.f32.mrf.mxu0 }
 0x19f   :  { %v3006_v46 = vadd.f32 %v750_v33, %v636_v23 }
 0x1a0   :  { %1388 = vmatmul.f32.gmra.mxu1 %v1066_v61  ;;  %2137 = vmatmul.msk.f32.gmra.mxu3 %vm925_vm4, %v2603_v38 }
 0x1a1   :  { %1274 = vmatmul.f32.gmra.mxu0 %v2802_v17  ;;  %2120 = vmatmul.msk.f32.vlgmr.msrb.gmra.mxu2 %vm925_vm4, %v2582_v30 }
 0x1a3   :  { %v1153_v31 = vpop.f32.mrf.mxu3 }
 0x1a4   :  { %v998_v43 = vpop.f32.mrf.mxu2 }
 0x1a5   :  { %v3015_v55 = vadd.f32 %v1149_v39, %v998_v43  ;;  %v900_v53 = vpop.f32.mrf.mxu1 }
 0x1a6   :  { %v3017_v57 = vpop.f32.mrf.mxu0 }
 0x1a8   :  { %1394 = vmatmul.f32.gmra.mxu1 %v1074_v58  ;;  %2138 = vmatmul.msk.f32.gmra.mxu3 %vm925_vm4, %v2628_v51 }
 0x1a9   :  { %1279 = vmatmul.f32.gmra.mxu0 %v2826_v27  ;;  %2121 = vmatmul.msk.f32.gmra.mxu2 %vm925_vm4, %v2603_v38 }
 0x1ab   :  { %v1157_v61 = vpop.f32.mrf.mxu3 }
 0x1ac   :  { %v1006_v30 = vpop.f32.mrf.mxu2 }
 0x1ad   :  { %v3026_v17 = vadd.f32 %v1153_v31, %v1006_v30  ;;  %v904_v33 = vpop.f32.mrf.mxu1 }
 0x1ae   :  { %v817_v0 = vpop.f32.mrf.mxu0 }
 0x1af   :  { %v818_v21 = vadd.f32 %v817_v0, %v2910_v20 }
 0x1b0   :  { %1400 = vmatmul.f32.gmra.mxu1 %v1082_v34  ;;  %2139 = vmatmul.msk.f32.gmra.mxu3 %vm925_vm4, %v2654_v60 }
 0x1b1   :  { %v3033_v58 = vadd.f32 %v900_v53, %v818_v21  ;;  %1284 = vmatmul.f32.gmra.mxu0 %v2850_v52  ;;  %2122 = vmatmul.msk.f32.gmra.mxu2 %vm925_vm4, %v2628_v51 }
 0x1b3   :  { %v1161_v38 = vpop.f32.mrf.mxu3 }
 0x1b4   :  { %v1014_v27 = vpop.f32.mrf.mxu2 }
 0x1b5   :  { %v3038_v40 = vadd.f32 %v1157_v61, %v1014_v27  ;;  %v908_v63 = vpop.f32.mrf.mxu1 }
 0x1b6   :  { %v821_v22 = vpop.f32.mrf.mxu0 }
 0x1b7   :  { %v822_v20 = vadd.f32 %v821_v22, %v2934_v8 }
 0x1b8   :  { %1406 = vmatmul.f32.gmra.mxu1 %v1090_v45  ;;  %2140 = vmatmul.msk.f32.gmra.mxu3 %vm925_vm4, %v2680_v28 }
 0x1b9   :  { %v3045_v34 = vadd.f32 %v904_v33, %v822_v20  ;;  %1289 = vmatmul.f32.gmra.mxu0 %v2874_v36  ;;  %2123 = vmatmul.msk.f32.gmra.mxu2 %vm925_vm4, %v2654_v60 }
 0x1bb   :  { %v1165_v51 = vpop.f32.mrf.mxu3 }
 0x1bc   :  { %v1022_v52 = vpop.f32.mrf.mxu2 }
 0x1bd   :  { %v3050_v39 = vadd.f32 %v1161_v38, %v1022_v52  ;;  %v912_v3 = vpop.f32.mrf.mxu1 }
 0x1be   :  { %v825_v23 = vpop.f32.mrf.mxu0 }
 0x1bf   :  { %v826_v8 = vadd.f32 %v825_v23, %v2957_v19 }
 0x1c0   :  { %1412 = vmatmul.f32.gmra.mxu1 %v1098_v35  ;;  %2141 = vmatmul.msk.f32.gmra.mxu3 %vm925_vm4, %v2706_v48 }
 0x1c1   :  { %v3057_v45 = vadd.f32 %v908_v63, %v826_v8  ;;  %1294 = vmatmul.f32.gmra.mxu0 %v2898_v9  ;;  %2124 = vmatmul.msk.f32.gmra.mxu2 %vm925_vm4, %v2680_v28 }
 0x1c3   :  { %v1169_v60 = vpop.f32.mrf.mxu3 }
 0x1c4   :  { %v1030_v36 = vpop.f32.mrf.mxu2 }
 0x1c5   :  { %v3062_v31 = vadd.f32 %v1165_v51, %v1030_v36  ;;  %v916_v43 = vpop.f32.mrf.mxu1 }
 0x1c6   :  { %v829_v53 = vpop.f32.mrf.mxu0 }
 0x1c7   :  { %v830_v19 = vadd.f32 %v829_v53, %v2976_v18 }
 0x1c8   :  { %1418 = vmatmul.f32.gmra.mxu1 %v1106_v47  ;;  %2142 = vmatmul.msk.f32.gmra.mxu3 %vm925_vm4, %v2732_v56 }
 0x1c9   :  { %v3069_v35 = vadd.f32 %v912_v3, %v830_v19  ;;  %1299 = vmatmul.f32.gmra.mxu0 %v2922_v4  ;;  %2125 = vmatmul.msk.f32.gmra.mxu2 %vm925_vm4, %v2706_v48 }
 0x1cb   :  { %v1173_v28 = vpop.f32.mrf.mxu3 }
 0x1cc   :  { %v1038_v9 = vpop.f32.mrf.mxu2 }
 0x1cd   :  { %v3074_v61 = vadd.f32 %v1169_v60, %v1038_v9  ;;  %v920_v30 = vpop.f32.mrf.mxu1 }
 0x1ce   :  { %v833_v33 = vpop.f32.mrf.mxu0 }
 0x1cf   :  { %v834_v18 = vadd.f32 %v833_v33, %v2992_v25 }
 0x1d0   :  { %1424 = vmatmul.f32.gmra.mxu1 %v1114_v15  ;;  %2143 = vmatmul.msk.f32.gmra.mxu3 %vm925_vm4, %v2758_v44 }
 0x1d1   :  { %v3081_v47 = vadd.f32 %v916_v43, %v834_v18  ;;  %1304 = vmatmul.f32.gmra.mxu0 %v2946_v11  ;;  %2126 = vmatmul.msk.f32.gmra.mxu2 %vm925_vm4, %v2732_v56 }
 0x1d3   :  { %v1177_v48 = vpop.f32.mrf.mxu3 }
 0x1d4   :  { %v1046_v4 = vpop.f32.mrf.mxu2 }
 0x1d5   :  { %v3086_v0 = vadd.f32 %v1173_v28, %v1046_v4  ;;  %v1335_v21 = vpop.f32.mrf.mxu1 }
 0x1d6   :  { %v837_v38 = vpop.f32.mrf.mxu0 }
 0x1d7   :  { %v838_v25 = vadd.f32 %v837_v38, %v3006_v46 }
 0x1d8   :  { %2144 = vmatmul.msk.f32.gmra.mxu3 %vm925_vm4, %v2784_v5 }
 0x1d9   :  { %v3091_v15 = vadd.f32 %v920_v30, %v838_v25  ;;  %1309 = vmatmul.f32.gmra.mxu0 %v2968_v59  ;;  %2127 = vmatmul.msk.f32.gmra.mxu2 %vm925_vm4, %v2758_v44 }
 0x1db   :  { %v3096_v11 = vpop.f32.mrf.mxu3 }
 0x1dc   :  { %v1054_v56 = vpop.f32.mrf.mxu2 }
 0x1dd   :  { %v3098_v27 = vadd.f32 %v1177_v48, %v1054_v56  ;;  %v1341_v63 = vpop.f32.mrf.mxu1 }
 0x1de   :  { %v1235_v22 = vpop.f32.mrf.mxu0 }
 0x1df   :  { %v1236_v20 = vadd.f32 %v1235_v22, %v3015_v55 }
 0x1e0   :  { %2145 = vmatmul.msk.f32.gmra.mxu3 %vm925_vm4, %v2810_v13 }
 0x1e1   :  { %2128 = vmatmul.msk.f32.gmra.mxu2 %vm925_vm4, %v2784_v5  ;;  %v3105_v46 = vadd.f32 %v1335_v21, %v1236_v20 }
 0x1e3   :  { %v1185_v59 = vpop.f32.mrf.mxu3 }
 0x1e4   :  { %v1062_v51 = vpop.f32.mrf.mxu2 }
 0x1e5   :  { %v1347_v44 = vpop.f32.mrf.mxu1 }
 0x1e6   :  { %v1240_v52 = vpop.f32.mrf.mxu0 }
 0x1e7   :  { %v1241_v3 = vadd.f32 %v1240_v52, %v3026_v17 }
 0x1e8   :  { %2146 = vmatmul.msk.f32.gmra.mxu3 %vm925_vm4, %v2834_v50 }
 0x1e9   :  { %2129 = vmatmul.msk.f32.gmra.mxu2 %vm925_vm4, %v2810_v13  ;;  %v3112_v55 = vadd.f32 %v1341_v63, %v1241_v3 }
 0x1eb   :  { %v1189_v23 = vpop.f32.mrf.mxu3 }
 0x1ec   :  { %v1070_v8 = vpop.f32.mrf.mxu2 }
 0x1ed   :  { %v3114_v60 = vadd.f32 %v1185_v59, %v1070_v8  ;;  %v1353_v5 = vpop.f32.mrf.mxu1 }
 0x1ee   :  { %v1245_v36 = vpop.f32.mrf.mxu0 }
 0x1ef   :  { %v1246_v43 = vadd.f32 %v1245_v36, %v3038_v40 }
 0x1f0   :  { %2147 = vmatmul.msk.f32.gmra.mxu3 %vm925_vm4, %v2858_v42 }
 0x1f1   :  { %2130 = vmatmul.msk.f32.gmra.mxu2 %vm925_vm4, %v2834_v50  ;;  %v3121_v17 = vadd.f32 %v1347_v44, %v1246_v43 }
 0x1f3   :  { %v1193_v53 = vpop.f32.mrf.mxu3 }
 0x1f4   :  { %v1078_v13 = vpop.f32.mrf.mxu2 }
 0x1f5   :  { %v3123_v19 = vadd.f32 %v1189_v23, %v1078_v13  ;;  %v1359_v28 = vpop.f32.mrf.mxu1  ;;  %v1182_v13 = vadd.f32 %v3096_v11, %v1062_v51 }
 0x1f6   :  { %v1250_v9 = vpop.f32.mrf.mxu0 }
 0x1f7   :  { %v1251_v30 = vadd.f32 %v1250_v9, %v3050_v39 }
 0x1f8   :  { %2148 = vmatmul.msk.f32.gmra.mxu3 %vm925_vm4, %v2882_v12 }
 0x1f9   :  { %2131 = vmatmul.msk.f32.gmra.mxu2 %vm925_vm4, %v2858_v42  ;;  %v3130_v40 = vadd.f32 %v1353_v5, %v1251_v30 }
 0x1fb   :  { %v1197_v33 = vpop.f32.mrf.mxu3 }
 0x1fc   :  { %v1086_v50 = vpop.f32.mrf.mxu2 }
 0x1fd   :  { %v3132_v18 = vadd.f32 %v1193_v53, %v1086_v50  ;;  %v1365_v21 = vpop.f32.mrf.mxu1 }
 0x1fe   :  { %v1255_v48 = vpop.f32.mrf.mxu0 }
 0x1ff   :  { %v1256_v4 = vadd.f32 %v1255_v48, %v3062_v31 }
 0x200   :  { %2149 = vmatmul.msk.f32.gmra.mxu3 %vm925_vm4, %v2906_v29 }
 0x201   :  { %2132 = vmatmul.msk.f32.gmra.mxu2 %vm925_vm4, %v2882_v12  ;;  %v1360_v39 = vadd.f32 %v1359_v28, %v1256_v4 }
 0x203   :  { %v1201_v38 = vpop.f32.mrf.mxu3 }
 0x204   :  { %v1094_v25 = vpop.f32.mrf.mxu2 }
 0x205   :  { %v3139_v42 = vadd.f32 %v1197_v33, %v1094_v25  ;;  %v1371_v22 = vpop.f32.mrf.mxu1 }
 0x206   :  { %v1260_v56 = vpop.f32.mrf.mxu0 }
 0x207   :  { %v1261_v63 = vadd.f32 %v1260_v56, %v3074_v61 }
 0x208   :  { %2150 = vmatmul.msk.f32.gmra.mxu3 %vm925_vm4, %v2930_v6 }
 0x209   :  { %2133 = vmatmul.msk.f32.gmra.mxu2 %vm925_vm4, %v2906_v29  ;;  %v1366_v31 = vadd.f32 %v1365_v21, %v1261_v63 }
 0x20b   :  { %v1205_v20 = vpop.f32.mrf.mxu3 }
 0x20c   :  { %v1102_v59 = vpop.f32.mrf.mxu2 }
 0x20d   :  { %v3146_v44 = vadd.f32 %v1201_v38, %v1102_v59  ;;  %v1377_v23 = vpop.f32.mrf.mxu1 }
 0x20e   :  { %v1265_v12 = vpop.f32.mrf.mxu0 }
 0x20f   :  { %v1266_v52 = vadd.f32 %v1265_v12, %v3086_v0 }
 0x210   :  { %2151 = vmatmul.msk.f32.gmra.mxu3 %vm925_vm4, %v2952_v41 }
 0x211   :  { %2134 = vmatmul.msk.f32.gmra.mxu2 %vm925_vm4, %v2930_v6  ;;  %v1372_v61 = vadd.f32 %v1371_v22, %v1266_v52 }
 0x213   :  { %v1209_v3 = vpop.f32.mrf.mxu3 }
 0x214   :  { %v1110_v8 = vpop.f32.mrf.mxu2 }
 0x215   :  { %v3153_v29 = vadd.f32 %v1205_v20, %v1110_v8  ;;  %v1383_v6 = vpop.f32.mrf.mxu1 }
 0x216   :  { %v1270_v5 = vpop.f32.mrf.mxu0 }
 0x217   :  { %v1271_v36 = vadd.f32 %v1270_v5, %v3098_v27 }
 0x219   :  { %2135 = vmatmul.msk.f32.gmra.mxu2 %vm925_vm4, %v2952_v41  ;;  %v1378_v43 = vadd.f32 %v1377_v23, %v1271_v36  ;;  %vm1614_vm4 = vcmask 261120  }
 0x21b   :  { %v1535_v0 = vpop.f32.mrf.mxu3 }
 0x21c   :  { %v1118_v53 = vpop.f32.mrf.mxu2 }
 0x21d   :  { %v3159_v28 = vadd.f32 %v1209_v3, %v1118_v53  ;;  %v1389_v41 = vpop.f32.mrf.mxu1 }
 0x21e   :  { %v1275_v9 = vpop.f32.mrf.mxu0 }
 0x21f   :  { %v1276_v30 = vadd.f32 %v1275_v9, %v1182_v13 }
 0x221   :  { %v1384_v33 = vadd.f32 %v1383_v6, %v1276_v30 }
 0x223   :  { %v1539_v50 = vpop.f32.mrf.mxu3 }
 0x224   :  { %v1452_v48 = vpop.f32.mrf.mxu2 }
 0x225   :  { %v1453_v4 = vadd.f32 %v1452_v48, %v3105_v46 }
 0x226   :  { %v1280_v21 = vpop.f32.mrf.mxu0 }
 0x227   :  { %v1536_v27 = vadd.f32 %v1535_v0, %v1453_v4  ;;  %v1281_v38 = vadd.f32 %v1280_v21, %v3114_v60 }
 0x229   :  { %v3164_v25 = vmul.f32 %v1536_v27, %v2846_v37  ;;  %v1390_v56 = vadd.f32 %v1389_v41, %v1281_v38 }
 0x22b   :  { %v1543_v11 = vpop.f32.mrf.mxu3 }
 0x22c   :  { %v1456_v51 = vpop.f32.mrf.mxu2 }
 0x22d   :  { %v1457_v63 = vadd.f32 %v1456_v51, %v3112_v55 }
 0x22f   :  { %v1540_v22 = vadd.f32 %v1539_v50, %v1457_v63  ;;  %v1395_v63 = vpop.f32.mrf.mxu1 }
 0x231   :  { %v3168_v20 = vmul.f32 %v1540_v22, %v2870_v54 }
 0x233   :  { %v1547_v59 = vpop.f32.mrf.mxu3 }
 0x234   :  { %v1460_v12 = vpop.f32.mrf.mxu2 }
 0x235   :  { %v1461_v46 = vadd.f32 %v1460_v12, %v3121_v17 }
 0x237   :  { %v1544_v52 = vadd.f32 %v1543_v11, %v1461_v46 }
 0x239   :  { %v3172_v60 = vmul.f32 %v1544_v52, %v2894_v1 }
 0x23b   :  { %v1551_v3 = vpop.f32.mrf.mxu3 }
 0x23c   :  { %v1464_v37 = vpop.f32.mrf.mxu2 }
 0x23d   :  { %v1465_v23 = vadd.f32 %v1464_v37, %v3130_v40 }
 0x23f   :  { %v1548_v8 = vadd.f32 %v1547_v59, %v1465_v23 }
 0x241   :  { %v3176_v5 = vmul.f32 %v1548_v8, %v2918_v10 }
 0x243   :  { %v1555_v55 = vpop.f32.mrf.mxu3 }
 0x244   :  { %v1468_v36 = vpop.f32.mrf.mxu2 }
 0x245   :  { %v1469_v54 = vadd.f32 %v1468_v36, %v1360_v39 }
 0x247   :  { %v1552_v0 = vadd.f32 %v1551_v3, %v1469_v54 }
 0x249   :  { %v3179_v53 = vmul.f32 %v1552_v0, %v2942_v7  ;;  %v1285_v7 = vpop.f32.mrf.mxu0 }
 0x24b   :  { %v1559_v17 = vpop.f32.mrf.mxu3 }
 0x24c   :  { %v1472_v13 = vpop.f32.mrf.mxu2 }
 0x24d   :  { %v1473_v6 = vadd.f32 %v1472_v13, %v1366_v31  ;;  %v810_v31 = vadd.f32 %v3004_v26, %v2862_v16  ;;  %v1286_v16 = vadd.f32 %v1285_v7, %v3123_v19 }
 0x24f   :  { %v1556_v1 = vadd.f32 %v1555_v55, %v1473_v6 }
 0x251   :  { %v3182_v9 = vmul.f32 %v1556_v1, %v2965_v32  ;;  %v1290_v22 = vpop.f32.mrf.mxu0 }
 0x252   :  { %v1291_v55 = vadd.f32 %v1290_v22, %v3132_v18 }
 0x253   :  { %v1563_v30 = vpop.f32.mrf.mxu3 }
 0x254   :  { %v1476_v40 = vpop.f32.mrf.mxu2 }
 0x255   :  { %v1477_v50 = vadd.f32 %v1476_v40, %v1372_v61  ;;  %v893_v61 = vadd.f32 %v2989_v2, %v810_v31  ;;  %v1396_v2 = vadd.f32 %v1395_v63, %v1286_v16 }
 0x257   :  { %v1560_v48 = vadd.f32 %v1559_v17, %v1477_v50 }
 0x259   :  { %v3185_v10 = vmul.f32 %v1560_v48, %v2982_v24  ;;  %v1295_v37 = vpop.f32.mrf.mxu0 }
 0x25a   :  { %v1296_v19 = vadd.f32 %v1295_v37, %v3139_v42 }
 0x25b   :  { %v1567_v4 = vpop.f32.mrf.mxu3 }
 0x25c   :  { %v1480_v39 = vpop.f32.mrf.mxu2 }
 0x25d   :  { %v1481_v21 = vadd.f32 %v1480_v39, %v1378_v43  ;;  %v814_v43 = vadd.f32 %v3017_v57, %v2886_v62 }
 0x25f   :  { %v1564_v27 = vadd.f32 %v1563_v30, %v1481_v21  ;;  %v897_v46 = vadd.f32 %v3002_v49, %v814_v43 }
 0x261   :  { %v3188_v38 = vmul.f32 %v1564_v27, %v2998_v14  ;;  %v1300_v0 = vpop.f32.mrf.mxu0 }
 0x262   :  { %v1301_v18 = vadd.f32 %v1300_v0, %v3146_v44 }
 0x263   :  { %v1571_v32 = vpop.f32.mrf.mxu3 }
 0x264   :  { %v1484_v41 = vpop.f32.mrf.mxu2 }
 0x265   :  { %v1485_v11 = vadd.f32 %v1484_v41, %v1384_v33  ;;  %v1401_v33 = vpop.f32.mrf.mxu1 }
 0x266   :  { %v1402_v36 = vadd.f32 %v1401_v33, %v1291_v55 }
 0x267   :  { %v1568_v51 = vadd.f32 %v1567_v4, %v1485_v11 }
 0x269   :  { %v3193_v24 = vmul.f32 %v1568_v51, %v893_v61  ;;  %v1305_v4 = vpop.f32.mrf.mxu0 }
 0x26a   :  { %v1306_v42 = vadd.f32 %v1305_v4, %v3153_v29 }
 0x26b   :  { %v1575_v59 = vpop.f32.mrf.mxu3 }
 0x26c   :  { %v1488_v12 = vpop.f32.mrf.mxu2 }
 0x26d   :  { %v1489_v14 = vadd.f32 %v1488_v12, %v1390_v56  ;;  %v1407_v56 = vpop.f32.mrf.mxu1 }
 0x26e   :  { %v1408_v1 = vadd.f32 %v1407_v56, %v1296_v19 }
 0x26f   :  { %v1572_v26 = vadd.f32 %v1571_v32, %v1489_v14 }
 0x271   :  { %v3199_v52 = vmul.f32 %v1572_v26, %v897_v46  ;;  %v1310_v41 = vpop.f32.mrf.mxu0 }
 0x272   :  { %v1311_v44 = vadd.f32 %v1310_v41, %v3159_v28 }
 0x273   :  { %v1579_v8 = vpop.f32.mrf.mxu3 }
 0x274   :  { %v1492_v3 = vpop.f32.mrf.mxu2 }
 0x275   :  { %v1493_v23 = vadd.f32 %v1492_v3, %v1396_v2  ;;  %v1413_v50 = vpop.f32.mrf.mxu1 }
 0x276   :  { %v1414_v21 = vadd.f32 %v1413_v50, %v1301_v18 }
 0x277   :  { %v1576_v62 = vadd.f32 %v1575_v59, %v1493_v23 }
 0x279   :  { %v1608_v57 = vmul.f32 %v1576_v62, %v3033_v58 }
 0x27b   :  { %v1583_v13 = vpop.f32.mrf.mxu3 }
 0x27c   :  { %v1496_v54 = vpop.f32.mrf.mxu2 }
 0x27d   :  { %v1497_v49 = vadd.f32 %v1496_v54, %v1402_v36  ;;  %v1419_v32 = vpop.f32.mrf.mxu1  ;;  %v1649_v54 = vsel %vm1614_vm4, %v1608_v57, 0  ;;  %v1646_v57 = vsel %vm1614_vm4, %v3199_v52, 0  ;;  %v1643_v52 = vsel %vm1614_vm4, %v3193_v24, 0 }
 0x27e   :  { %v1420_v11 = vadd.f32 %v1419_v32, %v1306_v42  ;;  %v3273_v18 = vand.u32 4294901760, %v1646_v57  ;;  %v1640_v24 = vsel %vm1614_vm4, %v3188_v38, 0  ;;  %v1637_v38 = vsel %vm1614_vm4, %v3185_v10, 0 }
 0x27f   :  { %v1580_v17 = vadd.f32 %v1579_v8, %v1497_v49  ;;  %v3301_v32 = vand.u32 4294901760, %v1640_v24  ;;  %v1634_v10 = vsel %vm1614_vm4, %v3182_v9, 0  ;;  %v1631_v9 = vsel %vm1614_vm4, %v3179_v53, 0 }
 0x280   :  { %v3294_v42 = vsub.f32 %v1646_v57, %v3273_v18  ;;  %v1628_v53 = vsel %vm1614_vm4, %v3176_v5, 0  ;;  %v1625_v5 = vsel %vm1614_vm4, %v3172_v60, 0  ;;  %v1622_v60 = vsel %vm1614_vm4, %v3168_v20, 0 }
 0x281   :  { %v1609_v6 = vmul.f32 %v1580_v17, %v3045_v34  ;;  %v1619_v20 = vsel %vm1614_vm4, %v3164_v25, 0 }
 0x282   :  { %v3397_v25 = vand.u32 4294901760, %v1619_v20 }
 0x283   :  { %v1587_v39 = vpop.f32.mrf.mxu3 }
 0x284   :  { %v1500_v30 = vpop.f32.mrf.mxu2 }
 0x285   :  { %v1501_v40 = vadd.f32 %v1500_v30, %v1408_v1  ;;  %v1425_v22 = vpop.f32.mrf.mxu1 }
 0x286   :  { %v1426_v59 = vadd.f32 %v1425_v22, %v1311_v44  ;;  %v3329_v22 = vand.u32 4294901760, %v1634_v10 }
 0x287   :  { %v1584_v48 = vadd.f32 %v1583_v13, %v1501_v40 }
 0x289   :  { %v1610_v58 = vmul.f32 %v1584_v48, %v3057_v45 }
 0x28b   :  { %v1591_v61 = vpop.f32.mrf.mxu3  ;;  %v1655_v37 = vsel %vm1614_vm4, %v1610_v58, 0 }
 0x28c   :  { %v1504_v27 = vpop.f32.mrf.mxu2  ;;  %v3236_v62 = vand.u32 4294901760, %v1655_v37 }
 0x28d   :  { %v1505_v7 = vadd.f32 %v1504_v27, %v1414_v21  ;;  %v3287_v21 = vand.u32 4294901760, %v1643_v52 }
 0x28e   :  { %v3252_v17 = vsub.f32 %v1655_v37, %v3236_v62  ;;  %v3357_v37 = vand.u32 4294901760, %v1628_v53 }
 0x28f   :  { %v1588_v31 = vadd.f32 %v1587_v39, %v1505_v7 }
 0x290   :  { %v1727_v50 = vand.u32 4294901760, %v3252_v17 }
 0x291   :  { %v1611_v34 = vmul.f32 %v1588_v31, %v3069_v35 }
 0x292   :  { %v1728_v4 = vsub.f32 %v3252_v17, %v1727_v50 }
 0x293   :  { %v1595_v46 = vpop.f32.mrf.mxu3  ;;  %v1658_v26 = vsel %vm1614_vm4, %v1611_v34, 0 }
 0x294   :  { %v1508_v51 = vpop.f32.mrf.mxu2  ;;  %v3222_v3 = vand.u32 4294901760, %v1658_v26  ;;  %v1729_v27 = vand.u32 4294901760, %v1728_v4 }
 0x295   :  { %v1509_v63 = vadd.f32 %v1508_v51, %v1420_v11  ;;  %v3308_v11 = vsub.f32 %v1643_v52, %v3287_v21  ;;  %v3315_v51 = vand.u32 4294901760, %v1637_v38 }
 0x296   :  { %v3234_v55 = vsub.f32 %v1658_v26, %v3222_v3 }
 0x297   :  { %v1592_v43 = vadd.f32 %v1591_v61, %v1509_v63  ;;  %v1745_v61 = vand.u32 4294901760, %v3294_v42 }
 0x298   :  { %v1721_v13 = vand.u32 4294901760, %v3234_v55 }
 0x299   :  { %v1612_v45 = vmul.f32 %v1592_v43, %v3081_v47  ;;  %v1746_v44 = vsub.f32 %v3294_v42, %v1745_v61  ;;  %v3322_v43 = vsub.f32 %v1640_v24, %v3301_v32 }
 0x29a   :  { %v1722_v30 = vsub.f32 %v3234_v55, %v1721_v13 }
 0x29b   :  { %v1661_v29 = vsel %vm1614_vm4, %v1612_v45, 0  ;;  %v1751_v45 = vand.u32 4294901760, %v3308_v11 }
 0x29c   :  { %v1512_v12 = vpop.f32.mrf.mxu2  ;;  %v3212_v35 = vand.u32 4294901760, %v1661_v29  ;;  %v1723_v48 = vand.u32 4294901760, %v1722_v30  ;;  %v3378_v30 = vsub.f32 %v1628_v53, %v3357_v37 }
 0x29d   :  { %v1513_v14 = vadd.f32 %v1512_v12, %v1426_v59  ;;  %v1747_v59 = vand.u32 4294901760, %v1746_v44  ;;  %v1752_v12 = vsub.f32 %v3308_v11, %v1751_v45 }
 0x29e   :  { %v3220_v47 = vsub.f32 %v1661_v29, %v3212_v35  ;;  %v3336_v29 = vsub.f32 %v1637_v38, %v3315_v51 }
 0x29f   :  { %v1596_v16 = vadd.f32 %v1595_v46, %v1513_v14  ;;  %v1757_v14 = vand.u32 4294901760, %v3322_v43  ;;  %v3343_v46 = vand.u32 4294901760, %v1631_v9 }
 0x2a0   :  { %v1715_v36 = vand.u32 4294901760, %v3220_v47 }
 0x2a1   :  { %v1613_v33 = vmul.f32 %v1596_v16, %v3091_v15  ;;  %v1652_v15 = vsel %vm1614_vm4, %v1609_v6, 0  ;;  %v3259_v6 = vand.u32 4294901760, %v1649_v54  ;;  %v1753_v16 = vand.u32 4294901760, %v1752_v12 }
 0x2a2   :  { %v3245_v49 = vand.u32 4294901760, %v1652_v15  ;;  %v1716_v0 = vsub.f32 %v3220_v47, %v1715_v36  ;;  %v1758_v26 = vsub.f32 %v3322_v43, %v1757_v14  ;;  %v3474_v12 = vmov 0  }
 0x2a3   :  { %v1664_v28 = vsel %vm1614_vm4, %v1613_v33, 0  ;;  %v3280_v58 = vsub.f32 %v1649_v54, %v3259_v6  ;;  %v3350_v33 = vsub.f32 %v1634_v10, %v3329_v22  ;;  %v3364_v54 = vsub.f32 %v1631_v9, %v3343_v46 }
 0x2a4   :  { %v3217_v2 = vand.u32 4294901760, %v1664_v28  ;;  %v1717_v1 = vand.u32 4294901760, %v1716_v0  ;;  %v3266_v40 = vsub.f32 %v1652_v15, %v3245_v49  ;;  %v1759_v15 = vand.u32 4294901760, %v1758_v26 }
 0x2a5   :  { %v1739_v31 = vand.u32 4294901760, %v3280_v58  ;;  %v3371_v0 = vand.u32 4294901760, %v1625_v5  ;;  %v1775_v52 = vand.u32 4294901760, %v3364_v54  ;;  %v1798_v9 = vsub.f32 %v1619_v20, %v3397_v25 }
 0x2a6   :  { %1667 = vmatpush.xpose.msrb.mxu0 %v3217_v2  ;;  %1863 = vmatpush.xpose.msra.mxu3 %v3217_v2  ;;  %v3228_v23 = vsub.f32 %v1664_v28, %v3217_v2  ;;  %v1733_v39 = vand.u32 4294901760, %v3266_v40  ;;  %v1763_v28 = vand.u32 4294901760, %v3336_v29  ;;  %v1616_v53 = vsel %vm1614_vm4, 1.0, %v3474_v12 }
 0x2a7   :  { %v1740_v41 = vsub.f32 %v3280_v58, %v1739_v31  ;;  %v1776_v24 = vsub.f32 %v3364_v54, %v1775_v52 }
 0x2a8   :  { %1810 = vmatpush.xpose.msra.mxu2 %v3228_v23  ;;  %v1709_v8 = vand.u32 4294901760, %v3228_v23  ;;  %v1734_v7 = vsub.f32 %v3266_v40, %v1733_v39 }
 0x2a9   :  { %v1741_v63 = vand.u32 4294901760, %v1740_v41  ;;  %v1777_v38 = vand.u32 4294901760, %v1776_v24 }
 0x2aa   :  { %1669 = vmatpush.xpose.msrb.mxu0 %v3212_v35  ;;  %1865 = vmatpush.xpose.msra.mxu3 %v3212_v35  ;;  %v1710_v56 = vsub.f32 %v3228_v23, %v1709_v8  ;;  %v1735_v34 = vand.u32 4294901760, %v1734_v7  ;;  %v1781_v7 = vand.u32 4294901760, %v3378_v30 }
 0x2ac   :  { %1813 = vmatpush.xpose.msra.mxu2 %v3220_v47  ;;  %v1711_v19 = vand.u32 4294901760, %v1710_v56  ;;  %v1764_v56 = vsub.f32 %v3336_v29, %v1763_v28 }
 0x2ae   :  { %1671 = vmatpush.xpose.msrb.mxu0 %v3222_v3  ;;  %1712 = vmatpush.xpose.msrb.mxu1 %v1711_v19  ;;  %v1769_v19 = vand.u32 4294901760, %v3350_v33  ;;  %v1765_v57 = vand.u32 4294901760, %v1764_v56 }
 0x2af   :  { %1867 = vmatpush.xpose.msra.mxu3 %v3222_v3 }
 0x2b0   :  { %1816 = vmatpush.xpose.msra.mxu2 %v3234_v55 }
 0x2b2   :  { %1673 = vmatpush.xpose.msrb.mxu0 %v3236_v62  ;;  %1718 = vmatpush.xpose.msrb.mxu1 %v1717_v1  ;;  %v1770_v1 = vsub.f32 %v3350_v33, %v1769_v19 }
 0x2b3   :  { %1869 = vmatpush.xpose.msra.mxu3 %v3236_v62 }
 0x2b4   :  { %1819 = vmatpush.xpose.msra.mxu2 %v3252_v17  ;;  %v1771_v4 = vand.u32 4294901760, %v1770_v1 }
 0x2b6   :  { %1675 = vmatpush.xpose.msrb.mxu0 %v3245_v49  ;;  %1724 = vmatpush.xpose.msrb.mxu1 %v1723_v48  ;;  %v3385_v48 = vand.u32 4294901760, %v1622_v60 }
 0x2b7   :  { %1871 = vmatpush.xpose.msra.mxu3 %v3245_v49 }
 0x2b8   :  { %1822 = vmatpush.xpose.msra.mxu2 %v3266_v40  ;;  %v1792_v41 = vsub.f32 %v1622_v60, %v3385_v48 }
 0x2ba   :  { %1677 = vmatpush.xpose.msrb.mxu0 %v3259_v6  ;;  %1730 = vmatpush.xpose.msrb.mxu1 %v1729_v27  ;;  %v3392_v27 = vsub.f32 %v1625_v5, %v3371_v0 }
 0x2bb   :  { %1873 = vmatpush.xpose.msra.mxu3 %v3259_v6 }
 0x2bc   :  { %1825 = vmatpush.xpose.msra.mxu2 %v3280_v58  ;;  %v1787_v10 = vand.u32 4294901760, %v3392_v27 }
 0x2be   :  { %1679 = vmatpush.xpose.msrb.mxu0 %v3273_v18  ;;  %1736 = vmatpush.xpose.msrb.mxu1 %v1735_v34  ;;  %v1782_v34 = vsub.f32 %v3378_v30, %v1781_v7  ;;  %v1788_v44 = vsub.f32 %v3392_v27, %v1787_v10 }
 0x2bf   :  { %1875 = vmatpush.xpose.msra.mxu3 %v3273_v18 }
 0x2c0   :  { %1828 = vmatpush.xpose.msra.mxu2 %v3294_v42  ;;  %v1789_v26 = vand.u32 4294901760, %v1788_v44 }
 0x2c2   :  { %1681 = vmatpush.xpose.msrb.mxu0 %v3287_v21  ;;  %1742 = vmatpush.xpose.msrb.mxu1 %v1741_v63  ;;  %v1783_v63 = vand.u32 4294901760, %v1782_v34 }
 0x2c3   :  { %1877 = vmatpush.xpose.msra.mxu3 %v3287_v21 }
 0x2c4   :  { %1831 = vmatpush.xpose.msra.mxu2 %v3308_v11 }
 0x2c6   :  { %1683 = vmatpush.xpose.msrb.mxu0 %v3301_v32  ;;  %1748 = vmatpush.xpose.msrb.mxu1 %v1747_v59  ;;  %v1793_v59 = vand.u32 4294901760, %v1792_v41 }
 0x2c7   :  { %1879 = vmatpush.xpose.msra.mxu3 %v3301_v32 }
 0x2c8   :  { %1834 = vmatpush.xpose.msra.mxu2 %v3322_v43  ;;  %v1794_v5 = vsub.f32 %v1792_v41, %v1793_v59 }
 0x2ca   :  { %1685 = vmatpush.xpose.msrb.mxu0 %v3315_v51  ;;  %1754 = vmatpush.xpose.msrb.mxu1 %v1753_v16  ;;  %v1699_v16 = vsub.f32 %v1616_v53, %v1616_v53  ;;  %v1795_v60 = vand.u32 4294901760, %v1794_v5 }
 0x2cb   :  { %1881 = vmatpush.xpose.msra.mxu3 %v3315_v51 }
 0x2cc   :  { %1837 = vmatpush.xpose.msra.mxu2 %v3336_v29  ;;  %v1700_v56 = vand.u32 4294901760, %v1699_v16 }
 0x2ce   :  { %1687 = vmatpush.xpose.msrb.mxu0 %v3329_v22  ;;  %1760 = vmatpush.xpose.msrb.mxu1 %v1759_v15  ;;  %v1799_v15 = vand.u32 4294901760, %v1798_v9  ;;  %v1701_v47 = vsub.f32 %v1699_v16, %v1700_v56 }
 0x2cf   :  { %1883 = vmatpush.xpose.msra.mxu3 %v3329_v22 }
 0x2d0   :  { %1840 = vmatpush.xpose.msra.mxu2 %v3350_v33 }
 0x2d2   :  { %1689 = vmatpush.xpose.msrb.mxu0 %v3343_v46  ;;  %1766 = vmatpush.xpose.msrb.mxu1 %v1765_v57  ;;  %v1800_v57 = vsub.f32 %v1798_v9, %v1799_v15 }
 0x2d3   :  { %1885 = vmatpush.xpose.msra.mxu3 %v3343_v46 }
 0x2d4   :  { %1843 = vmatpush.xpose.msra.mxu2 %v3364_v54  ;;  %v1801_v1 = vand.u32 4294901760, %v1800_v57 }
 0x2d6   :  { %1691 = vmatpush.xpose.msrb.mxu0 %v3357_v37  ;;  %1772 = vmatpush.xpose.msrb.mxu1 %v1771_v4 }
 0x2d7   :  { %1887 = vmatpush.xpose.msra.mxu3 %v3357_v37 }
 0x2d8   :  { %1846 = vmatpush.xpose.msra.mxu2 %v3378_v30 }
 0x2da   :  { %1693 = vmatpush.xpose.msrb.mxu0 %v3371_v0  ;;  %1778 = vmatpush.xpose.msrb.mxu1 %v1777_v38 }
 0x2db   :  { %1889 = vmatpush.xpose.msra.mxu3 %v3371_v0 }
 0x2dc   :  { %1849 = vmatpush.xpose.msra.mxu2 %v3392_v27 }
 0x2de   :  { %1695 = vmatpush.xpose.msrb.mxu0 %v3385_v48  ;;  %1784 = vmatpush.xpose.msrb.mxu1 %v1783_v63 }
 0x2df   :  { %1891 = vmatpush.xpose.msra.mxu3 %v3385_v48 }
 0x2e0   :  { %1852 = vmatpush.xpose.msra.mxu2 %v1792_v41 }
 0x2e2   :  { %1697 = vmatpush.xpose.msrb.mxu0 %v3397_v25  ;;  %1790 = vmatpush.xpose.msrb.mxu1 %v1789_v26 }
 0x2e3   :  { %1893 = vmatpush.xpose.msra.mxu3 %v3397_v25 }
 0x2e4   :  { %1855 = vmatpush.xpose.msra.mxu2 %v1798_v9 }
 0x2e6   :  { %1904 = vmatpush.xpose.msra.mxu0 %v1709_v8  ;;  %1796 = vmatpush.xpose.msrb.mxu1 %v1795_v60 }
 0x2e7   :  { %1897 = vmatmul.f32.vlgmr.msra.gmra.mxu3 %v1700_v56  ;;  %1858 = vmatmul.f32.vlgmr.msra.gmra.mxu2 %v1699_v16 }
 0x2ea   :  { %1908 = vmatpush.xpose.msra.mxu0 %v1715_v36  ;;  %1802 = vmatpush.xpose.msrb.mxu1 %v1801_v1 }
 0x2ee   :  { %1912 = vmatpush.xpose.msra.mxu0 %v1721_v13  ;;  %1971 = vmatpush.xpose.msra.mxu1 %v3217_v2  ;;  %v1702_v2 = vand.u32 4294901760, %v1701_v47 }
 0x2f0   :  { %1703 = vmatmul.f32.vlgmr.msrb.gmra.mxu0 %v1702_v2 }
 0x2f2   :  { %1916 = vmatpush.xpose.msra.mxu0 %v1727_v50  ;;  %1973 = vmatpush.xpose.msra.mxu1 %v3212_v35  ;;  %v2194_v35 = vmov 1.0  }
 0x2f3   :  { %2152 = vmatmul.msk.f32.vlgmr.msrb.gmra.mxu1 %vm1614_vm4, %v2194_v35 }
 0x2f6   :  { %1920 = vmatpush.xpose.msra.mxu0 %v1733_v39  ;;  %1975 = vmatpush.xpose.msra.mxu1 %v3222_v3 }
 0x2fa   :  { %1924 = vmatpush.xpose.msra.mxu0 %v1739_v31  ;;  %1977 = vmatpush.xpose.msra.mxu1 %v3236_v62 }
 0x2fe   :  { %1928 = vmatpush.xpose.msra.mxu0 %v1745_v61  ;;  %1979 = vmatpush.xpose.msra.mxu1 %v3245_v49 }
 0x302   :  { %1932 = vmatpush.xpose.msra.mxu0 %v1751_v45  ;;  %1981 = vmatpush.xpose.msra.mxu1 %v3259_v6 }
 0x306   :  { %1936 = vmatpush.xpose.msra.mxu0 %v1757_v14  ;;  %1983 = vmatpush.xpose.msra.mxu1 %v3273_v18 }
 0x30a   :  { %1940 = vmatpush.xpose.msra.mxu0 %v1763_v28  ;;  %1985 = vmatpush.xpose.msra.mxu1 %v3287_v21 }
 0x30e   :  { %1944 = vmatpush.xpose.msra.mxu0 %v1769_v19  ;;  %1987 = vmatpush.xpose.msra.mxu1 %v3301_v32 }
 0x312   :  { %1948 = vmatpush.xpose.msra.mxu0 %v1775_v52  ;;  %1989 = vmatpush.xpose.msra.mxu1 %v3315_v51 }
 0x316   :  { %1952 = vmatpush.xpose.msra.mxu0 %v1781_v7  ;;  %1991 = vmatpush.xpose.msra.mxu1 %v3329_v22 }
 0x31a   :  { %1956 = vmatpush.xpose.msra.mxu0 %v1787_v10  ;;  %1993 = vmatpush.xpose.msra.mxu1 %v3343_v46 }
 0x31e   :  { %1960 = vmatpush.xpose.msra.mxu0 %v1793_v59  ;;  %1995 = vmatpush.xpose.msra.mxu1 %v3357_v37 }
 0x322   :  { %1964 = vmatpush.xpose.msra.mxu0 %v1799_v15  ;;  %1997 = vmatpush.xpose.msra.mxu1 %v3371_v0 }
 0x325   :  { %2153 = vmatmul.msk.f32.vlgmr.msra.gmra.mxu0 %vm1614_vm4, %v2194_v35 }
 0x326   :  { %1999 = vmatpush.xpose.msra.mxu1 %v3385_v48 }
 0x32a   :  { %2001 = vmatpush.xpose.msra.mxu1 %v3397_v25 }
 0x32d   :  { %2154 = vmatmul.msk.f32.vlgmr.msra.gmra.mxu1 %vm1614_vm4, %v2194_v35 }
 0x36a   :  { %v1859_v55 = vpop.f32.mrf.mxu2  ;;  %v1898_v36 = vpop.f32.mrf.mxu3 }
 0x36d   :  { %v1704_v23 = vpop.f32.mrf.mxu0 }
 0x370   :  { %v1805_v3 = vpop.f32.mrf.mxu1 }
 0x371   :  { %v1806_v8 = vadd.f32 %v1805_v3, %v1704_v23 }
 0x373   :  { %v1860_v62 = vadd.f32 %v1859_v55, %v1806_v8 }
 0x375   :  { %v1899_v49 = vadd.f32 %v1898_v36, %v1860_v62 }
 0x3a2   :  { %v1967_v17 = vpop.f32.mrf.mxu0 }
 0x3a3   :  { %v1968_v13 = vadd.f32 %v1967_v17, %v1899_v49 }
 0x3aa   :  { %v2004_v6 = vpop.f32.mrf.mxu1 }
 0x3ab   :  { %v2005_v40 = vadd.f32 %v2004_v6, %v1968_v13 }
 0x3ad   :  { %2007 = vst [vmem:[#allocation2] sm:$0x1] %v2005_v40 }
 0x3ae   :  { %2018 = dma.vmem_to_hbm [thread:$0]  %s2014_s5, 16, %s2016_s8, [#allocation3]  }
 0x3af   :  { %2190 = dma.done.wait [#allocation3], 16  }
 0x3b0   :  { %2191 = vsyncadd [#allocation3], 4294967280 }
 0x3b1   :  { %2023 = vsyncpa [#allocation3], 1 }

</bundles_post_ra>
